<compile_context>
chip_gen: v7x
topology: tpu7x:2x2x1
jax: 0.10.0
libtpu: 0.0.40
codegen_flags: <defaults>
</compile_context>

<pallas_src>
import functools
import math

import jax
import jax.numpy as jnp
from jax import lax
from jax.experimental import pallas as pl
from jax.experimental.pallas import tpu as pltpu

_NEG = -1e30  # "minus infinity" that stays NaN-free through exp/max


def _round_up(x, m):
    return ((x + m - 1) // m) * m


def _vmem_cap_bytes():
    try:
        cap = pltpu.get_tpu_info().vmem_capacity_bytes
    except Exception:
        cap = 64 * 2 ** 20          # conservative fallback (v7x-sized VMEM)
    return int(cap * 3 // 4)        # leave headroom for compiler scratch


def _vmem_limit_bytes(MB, T_out, T_ctx, D, tv, cache_bytes, cap):
    f32, bf16, lane = 4, 2, 128
    M2 = MB * T_out
    # streamed (double-buffered): Ws tile (bf16), bs tile, output tile
    streamed = 2 * (D * tv * bf16 + max(tv, lane) * f32 + M2 * tv * f32)
    # resident activations (conservatively assume double buffers too)
    resident = 2 * (2 * M2 * D * f32 + MB * T_ctx * D * f32
                    + MB * T_ctx * lane * f32)
    # small constant weights
    weights = 2 * (2 * (D * D * bf16 + D * f32) + 3 * D * f32 + lane * f32)
    # VMEM scratch (attn + bf16 out_states + gate/log-gate/max/sum + cache)
    scratch = (MB * T_out * max(T_ctx, lane) * f32
               + M2 * D * bf16
               + 4 * M2 * lane * f32
               + cache_bytes)
    est = streamed + resident + weights + scratch
    return int(min(cap, max(32 * 2 ** 20, 2 * est)))


def pointer_generator_kernel(cache_logits,
                             mask_ref,
                             ds_ref, os_ref, ctx_ref, ids_ref,
                             wq_ref, bq_ref, wk_ref, bk_ref,
                             ws_ref, bs_ref, wg_ref, bg_ref,
                             out_ref,
                             attn_sc, osbf_sc, gate_sc, lgate_sc, m_sc, l_sc,
                             cache_sc=None):
    bi = pl.program_id(0)          # batch-group index
    p = pl.program_id(1)           # 0: logsumexp pass, 1: emit pass
    v = pl.program_id(2)           # vocab-tile index
    M2, D = os_ref.shape
    MB, T_ctx, _ = ctx_ref.shape
    T_out = M2 // MB
    tv = out_ref.shape[-1]

    @pl.when((p == 0) & (v == 0))
    def _init():
        # Attention, context vector and generation gate are vocab-independent:
        # computed once per batch group, kept resident in VMEM scratch.
        os2d = os_ref[...]                              # (M2, D) f32
        ds2d = ds_ref[...]
        ctx_f = ctx_ref[...]                            # (MB, T_ctx, D) f32
        os_bf = os2d.astype(jnp.bfloat16)
        osbf_sc[...] = os_bf                            # hoisted cast for all tiles
        ctx_bf = ctx_f.reshape(MB * T_ctx, D).astype(jnp.bfloat16)

        q = (jnp.dot(os_bf, wq_ref[...], preferred_element_type=jnp.float32)
             + bq_ref[...])
        k = (jnp.dot(ctx_bf, wk_ref[...], preferred_element_type=jnp.float32)
             + bk_ref[...])
        q3 = q.reshape(MB, T_out, D).astype(jnp.bfloat16)
        k3 = k.reshape(MB, T_ctx, D).astype(jnp.bfloat16)

        scores = jnp.einsum("bqd,bkd->bqk", q3, k3,
                            preferred_element_type=jnp.float32) * (D ** -0.5)
        scores = scores - jnp.max(scores, axis=-1, keepdims=True)
        es = jnp.exp(scores)
        attn = es * pl.reciprocal(jnp.sum(es, axis=-1, keepdims=True),
                                  approx=True)          # (MB, T_out, T_ctx)
        attn_sc[...] = attn

        ctx_vec = jnp.einsum("bqk,bkd->bqd",
                             attn.astype(jnp.bfloat16),
                             ctx_f.astype(jnp.bfloat16),
                             preferred_element_type=jnp.float32).reshape(M2, D)

        # p_gen gate: fused single lane-reduction (3 VPU multiplies + adds).
        wg = wg_ref[...]                                # (3, D): [os | ctx | ds]
        gate_lin = (jnp.sum(os2d * wg[0:1, :] + ctx_vec * wg[1:2, :]
                            + ds2d * wg[2:3, :], axis=-1, keepdims=True)
                    + bg_ref[...])
        gate = jax.nn.sigmoid(gate_lin)
        gate_sc[...] = gate
        lgate_sc[...] = jnp.log(gate)                   # for the empty-tile fast path

        m_sc[...] = jnp.full(m_sc.shape, _NEG, dtype=m_sc.dtype)
        l_sc[...] = jnp.zeros(l_sc.shape, dtype=l_sc.dtype)

    @pl.when(p == 0)
    def _accumulate():
        # Vocab-tile logits (bf16 x bf16 -> f32 on the MXU, M = MB*T_out).
        logits = (jnp.dot(osbf_sc[...], ws_ref[...],
                          preferred_element_type=jnp.float32) + bs_ref[...])
        if cache_logits:
            cache_sc[v] = logits.astype(cache_sc.dtype)
        # Online logsumexp over vocab tiles (running max / running sum).
        m_old = m_sc[...]
        m_new = jnp.maximum(m_old, jnp.max(logits, axis=-1, keepdims=True))
        l_sc[...] = (l_sc[...] * jnp.exp(m_old - m_new)
                     + jnp.sum(jnp.exp(logits - m_new), axis=-1, keepdims=True))
        m_sc[...] = m_new

    @pl.when(p == 1)
    def _emit():
        if cache_logits:
            logits = cache_sc[v].astype(jnp.float32)
        else:
            logits = (jnp.dot(osbf_sc[...], ws_ref[...],
                              preferred_element_type=jnp.float32) + bs_ref[...])
        lse = m_sc[...] + jnp.log(l_sc[...])
        log_p_vocab = logits - lse                      # (M2, tv)
        nonempty = mask_ref[bi, v]

        @pl.when(nonempty == 0)
        def _fast():
            # No context id falls inside this vocab tile -> p_ptr == 0 and
            # log(gate*p_vocab) = log(gate) + logit - lse (pure VPU add).
            out_ref[...] = (log_p_vocab + lgate_sc[...]).astype(out_ref.dtype)

        @pl.when(nonempty != 0)
        def _slow():
            p_vocab = jnp.exp(log_p_vocab)
            # scatter_add_ over the vocab axis as a one-hot matmul; repeated
            # ids sum correctly; iota offset by this tile's base.
            cols = v * tv + lax.broadcasted_iota(jnp.int32, (MB, T_ctx, tv), 2)
            onehot = (ids_ref[...] == cols).astype(jnp.bfloat16)
            p_ptr = jnp.einsum("bqs,bsv->bqv",
                               attn_sc[...].astype(jnp.bfloat16), onehot,
                               preferred_element_type=jnp.float32).reshape(M2, tv)
            gate = gate_sc[...]
            # TODO(synk): matches torch semantics; log() yields -inf where the
            # gate saturates to 0 and the vocab id is absent from the context.
            out_ref[...] = jnp.log(gate * p_vocab
                                   + (1.0 - gate) * p_ptr).astype(out_ref.dtype)


def pointer_generator(domainslots, out_states, context, context_plain, params,
                      *, vocab_tile=None, batch_block=None, cache_logits=None):
    B, T_out, D = out_states.shape
    T_ctx = context.shape[1]
    V = params["ws"].shape[1]

    vmem_cap = _vmem_cap_bytes()

    # --- vocab tiling: lane-dense tiles (multiple of 128), V padded up ------
    if vocab_tile is None:
        vocab_tile = 4096 if vmem_cap >= 90 * 2 ** 20 else 2048
        vocab_tile = min(vocab_tile, _round_up(V, 128))
    assert vocab_tile % 128 == 0, "vocab tile must be a multiple of 128 lanes"
    tv = vocab_tile
    V_pad = _round_up(V, tv)
    n_v = V_pad // tv

    # --- batch folding: aim for an MXU M dimension of ~256 ------------------
    if batch_block is None:
        target_mb = max(1, -(-256 // T_out))
        best = 1
        for cand in range(1, min(B, target_mb) + 1):
            if B % cand == 0:
                best = cand
        batch_block = best
        if batch_block * T_out < 128 and B > batch_block:
            # Divisor search collapsed (prime/awkward B): pad B instead.
            batch_block = min(B, target_mb)
        if batch_block == B and B % 2 == 0 and (B // 2) * T_out >= 256:
            # Keep >=2 batch groups so megacore parts can split the batch axis.
            batch_block = B // 2
    MB = batch_block
    B_pad = _round_up(B, MB)
    n_b = B_pad // MB
    if n_b > 1 and (MB * T_out) % 8 != 0:   # sublane-align folded M when tiled
        MB *= 8 // math.gcd(MB * T_out, 8)
        B_pad = _round_up(B, MB)
        n_b = B_pad // MB
    M2 = MB * T_out

    if B_pad > B:
        padb = B_pad - B
        domainslots = jnp.pad(domainslots, ((0, padb), (0, 0), (0, 0)))
        out_states = jnp.pad(out_states, ((0, padb), (0, 0), (0, 0)))
        context = jnp.pad(context, ((0, padb), (0, 0), (0, 0)))
        context_plain = jnp.pad(context_plain, ((0, padb), (0, 0)))

    # --- logits cache: skip pass-1 Ws stream + recompute when it fits -------
    if cache_logits is None or cache_logits:
        budget = vmem_cap // 3
        if M2 * V_pad * 4 <= budget:
            cache_logits, cache_dtype = True, jnp.float32
        elif M2 * V_pad * 2 <= budget:
            cache_logits, cache_dtype = True, jnp.bfloat16
        else:
            cache_logits, cache_dtype = False, None
    else:
        cache_dtype = None
    cache_bytes = (M2 * V_pad * jnp.dtype(cache_dtype).itemsize
                   if cache_logits else 0)

    # --- parameter packing: bf16 weights, padded vocab gets -inf bias -------
    ws = params["ws"].astype(jnp.float32)
    bs = params["bs"].astype(jnp.float32).reshape(1, V)
    if V_pad > V:
        ws = jnp.pad(ws, ((0, 0), (0, V_pad - V)))
        bs = jnp.pad(bs, ((0, 0), (0, V_pad - V)), constant_values=_NEG)
    # Contiguous-per-tile Ws layout: one large HBM transfer per streamed tile.
    ws_t = ws.reshape(D, n_v, tv).transpose(1, 0, 2).astype(jnp.bfloat16)
    wq = params["wq"].astype(jnp.bfloat16)
    wk = params["wk"].astype(jnp.bfloat16)
    bq = params["bq"].astype(jnp.float32).reshape(1, D)
    bk = params["bk"].astype(jnp.float32).reshape(1, D)
    wg = params["wg"].reshape(3, D).astype(jnp.float32)   # rows: [os | ctx | ds]
    bg = params["bg"].astype(jnp.float32).reshape(1, 1)

    ids = context_plain.astype(jnp.int32).reshape(B_pad, T_ctx, 1)
    os2d = out_states.astype(jnp.float32).reshape(B_pad * T_out, D)
    ds2d = domainslots.astype(jnp.float32).reshape(B_pad * T_out, D)
    ctx = context.astype(jnp.float32)

    # Per-(batch-group, vocab-tile) "contains a context id" mask (SMEM prefetch).
    tiles = (context_plain.astype(jnp.int32) // tv).reshape(n_b, MB * T_ctx)
    tile_mask = (jax.nn.one_hot(tiles, n_v, dtype=jnp.int32).sum(axis=1) > 0
                 ).astype(jnp.int32)                       # (n_b, n_v)

    # --- index maps (all receive the prefetched mask ref as trailing arg) ---
    act2d = lambda bi, p, v, m: (bi, 0)        # resident per-group activations
    act3d = lambda bi, p, v, m: (bi, 0, 0)
    wmap = lambda bi, p, v, m: (0, 0)          # constant small weights
    if cache_logits:
        # Pin Ws/bs to the last tile during the emit pass: no second stream,
        # and no re-fetch at the pass boundary.
        ws_map = lambda bi, p, v, m: (v * (1 - p) + (n_v - 1) * p, 0, 0)
        bs_map = lambda bi, p, v, m: (0, v * (1 - p) + (n_v - 1) * p)
    else:
        ws_map = lambda bi, p, v, m: (v, 0, 0)
        bs_map = lambda bi, p, v, m: (0, v)
    # Output block: pinned (unwritten) during p==0, streams during p==1.
    omap = lambda bi, p, v, m: (bi, v * p)

    scratch = [
        pltpu.VMEM((MB, T_out, T_ctx), jnp.float32),   # attention probs
        pltpu.VMEM((M2, D), jnp.bfloat16),             # bf16 out_states (hoisted cast)
        pltpu.VMEM((M2, 1), jnp.float32),              # gate
        pltpu.VMEM((M2, 1), jnp.float32),              # log(gate)
        pltpu.VMEM((M2, 1), jnp.float32),              # running max
        pltpu.VMEM((M2, 1), jnp.float32),              # running sum
    ]
    if cache_logits:
        scratch.append(pltpu.VMEM((n_v, M2, tv), cache_dtype))

    grid_spec = pltpu.PrefetchScalarGridSpec(
        num_scalar_prefetch=1,
        grid=(n_b, 2, n_v),
        in_specs=[
            pl.BlockSpec((M2, D), act2d),          # domainslots (flattened)
            pl.BlockSpec((M2, D), act2d),          # out_states (flattened)
            pl.BlockSpec((MB, T_ctx, D), act3d),   # context
            pl.BlockSpec((MB, T_ctx, 1), act3d),   # context_plain ids
            pl.BlockSpec((D, D), wmap),            # Wq
            pl.BlockSpec((1, D), wmap),            # bq
            pl.BlockSpec((D, D), wmap),            # Wk
            pl.BlockSpec((1, D), wmap),            # bk
            pl.BlockSpec((None, D, tv), ws_map),   # Ws vocab tile (contiguous)
            pl.BlockSpec((1, tv), bs_map),         # bs vocab tile
            pl.BlockSpec((3, D), wmap),            # Wg rows
            pl.BlockSpec((1, 1), wmap),            # bg
        ],
        out_specs=pl.BlockSpec((M2, tv), omap),
        scratch_shapes=scratch,
    )

    kernel = functools.partial(pointer_generator_kernel, cache_logits)
    out2d = pl.pallas_call(
        kernel,
        grid_spec=grid_spec,
        out_shape=jax.ShapeDtypeStruct((B_pad * T_out, V_pad), jnp.float32),
        compiler_params=pltpu.CompilerParams(
            dimension_semantics=("parallel", "arbitrary", "arbitrary"),
            vmem_limit_bytes=_vmem_limit_bytes(MB, T_out, T_ctx, D, tv,
                                               cache_bytes, vmem_cap)),
    )(tile_mask, ds2d, os2d, ctx, ids, wq, bq, wk, bk, ws_t, bs, wg, bg)

    return out2d.reshape(B_pad, T_out, V_pad)[:B, :, :V]


def pointer_generator_ref(domainslots, out_states, context, context_plain, params):
    """Pure-JAX f32 reference mirroring the PyTorch forward."""
    D = out_states.shape[-1]
    q = out_states @ params["wq"] + params["bq"]
    k = context @ params["wk"] + params["bk"]
    scores = jnp.einsum("btd,bsd->bts", q, k) / jnp.sqrt(jnp.float32(D))
    attn = jax.nn.softmax(scores, axis=-1)
    p_vocab = jax.nn.softmax(out_states @ params["ws"] + params["bs"], axis=-1)
    V = p_vocab.shape[-1]
    onehot = jax.nn.one_hot(context_plain, V, dtype=jnp.float32)
    p_ptr = jnp.einsum("bts,bsv->btv", attn, onehot)
    ctx_vec = jnp.einsum("bts,bsd->btd", attn, context)
    gen_vec = jnp.concatenate([out_states, ctx_vec, domainslots], axis=-1)
    gate = jax.nn.sigmoid(gen_vec @ params["wg"] + params["bg"])
    return jnp.log(gate * p_vocab + (1.0 - gate) * p_ptr)


if __name__ == "__main__":
    # Small deterministic shapes. V is not a multiple of the vocab tile so the
    # padding path is exercised; vocab_tile=256 gives 2 tiles.
    B, T_out, T_ctx, D, V = 2, 8, 16, 128, 500

    key = jax.random.PRNGKey(0)
    keys = jax.random.split(key, 12)
    scale = 0.1
    params = {
        "wq": scale * jax.random.normal(keys[0], (D, D), jnp.float32),
        "bq": scale * jax.random.normal(keys[1], (1, D), jnp.float32),
        "wk": scale * jax.random.normal(keys[2], (D, D), jnp.float32),
        "bk": scale * jax.random.normal(keys[3], (1, D), jnp.float32),
        "ws": scale * jax.random.normal(keys[4], (D, V), jnp.float32),
        "bs": scale * jax.random.normal(keys[5], (1, V), jnp.float32),
        "wg": scale * jax.random.normal(keys[6], (3 * D, 1), jnp.float32),
        "bg": scale * jax.random.normal(keys[7], (1, 1), jnp.float32),
    }
    domainslots = jax.random.normal(keys[8], (B, T_out, D), jnp.float32)
    out_states = jax.random.normal(keys[9], (B, T_out, D), jnp.float32)
    context = jax.random.normal(keys[10], (B, T_ctx, D), jnp.float32)
    # ids restricted to [0, 200): vocab tile 1 of 2 carries no pointer mass,
    # so the scalar-prefetched empty-tile fast path is exercised as well.
    context_plain = jax.random.randint(keys[11], (B, T_ctx), 0, 200, jnp.int32)

    ref = pointer_generator_ref(domainslots, out_states, context,
                                context_plain, params)

    # Default path: cached pass-0 logits + empty-tile fast path (2 vocab tiles).
    out = pointer_generator(domainslots, out_states, context, context_plain,
                            params, vocab_tile=256)
    out = jax.block_until_ready(out)
    assert out.shape == (B, T_out, V)
    assert bool(jnp.all(jnp.isfinite(out)))
    err = float(jnp.max(jnp.abs(out - ref)))
    # bf16 matmul inputs (f32 accumulation) -> slightly looser tolerance than f32.
    assert bool(jnp.allclose(out, ref, rtol=2e-2, atol=2e-2)), \
        f"cached path mismatch vs JAX reference (max abs err {err})"

    # Streaming (no logits cache) path, single vocab tile — covers the
    # recompute branch used when M2*V does not fit the VMEM cache budget.
    out2 = pointer_generator(domainslots, out_states, context, context_plain,
                             params, vocab_tile=512, cache_logits=False)
    out2 = jax.block_until_ready(out2)
    assert bool(jnp.all(jnp.isfinite(out2)))
    err2 = float(jnp.max(jnp.abs(out2 - ref)))
    assert bool(jnp.allclose(out2, ref, rtol=2e-2, atol=2e-2)), \
        f"streaming path mismatch vs JAX reference (max abs err {err2})"

    print("KERNEL_OK")
</pallas_src>

<mosaic_0001>
module attributes {stable_mosaic.version = 11 : i64} {
  func.func @pointer_generator_kernel(%arg0: i32, %arg1: i32, %arg2: i32, %arg3: memref<1x2xi32, #tpu.memory_space<smem>>, %arg4: memref<16x128xf32, #tpu.memory_space<vmem>>, %arg5: memref<16x128xf32, #tpu.memory_space<vmem>>, %arg6: memref<2x16x128xf32, #tpu.memory_space<vmem>>, %arg7: memref<2x16x1xi32, #tpu.memory_space<vmem>>, %arg8: memref<128x128xbf16, #tpu.memory_space<vmem>>, %arg9: memref<1x128xf32, #tpu.memory_space<vmem>>, %arg10: memref<128x128xbf16, #tpu.memory_space<vmem>>, %arg11: memref<1x128xf32, #tpu.memory_space<vmem>>, %arg12: memref<1x128x256xbf16, #tpu.memory_space<vmem>>, %arg13: memref<1x256xf32, #tpu.memory_space<vmem>>, %arg14: memref<3x128xf32, #tpu.memory_space<vmem>>, %arg15: memref<1x1xf32, #tpu.memory_space<vmem>>, %arg16: memref<16x256xf32, #tpu.memory_space<vmem>>, %arg17: memref<2x8x16xf32, #tpu.memory_space<vmem>>, %arg18: memref<16x128xbf16, #tpu.memory_space<vmem>>, %arg19: memref<16x1xf32, #tpu.memory_space<vmem>>, %arg20: memref<16x1xf32, #tpu.memory_space<vmem>>, %arg21: memref<16x1xf32, #tpu.memory_space<vmem>>, %arg22: memref<16x1xf32, #tpu.memory_space<vmem>>, %arg23: memref<2x16x256xf32, #tpu.memory_space<vmem>>) attributes {dimension_semantics = [#tpu.dimension_semantics<parallel>, #tpu.dimension_semantics<arbitrary>, #tpu.dimension_semantics<arbitrary>], iteration_bounds = array<i64: 1, 2, 2>, scalar_prefetch = 1 : i64, scratch_operands = 7 : i64, tpu.core_type = #tpu.core_type<tc>, window_params = [{transform_indices = @transform_0, window_bounds = array<i64: 16, 128>}, {transform_indices = @transform_1, window_bounds = array<i64: 16, 128>}, {transform_indices = @transform_2, window_bounds = array<i64: 2, 16, 128>}, {transform_indices = @transform_3, window_bounds = array<i64: 2, 16, 1>}, {pipeline_mode = #tpu.pipeline_mode<synchronous>, transform_indices = @transform_4, window_bounds = array<i64: 128, 128>}, {pipeline_mode = #tpu.pipeline_mode<synchronous>, transform_indices = @transform_5, window_bounds = array<i64: 1, 128>}, {pipeline_mode = #tpu.pipeline_mode<synchronous>, transform_indices = @transform_6, window_bounds = array<i64: 128, 128>}, {pipeline_mode = #tpu.pipeline_mode<synchronous>, transform_indices = @transform_7, window_bounds = array<i64: 1, 128>}, {transform_indices = @transform_8, window_bounds = array<i64: 1, 128, 256>}, {transform_indices = @transform_9, window_bounds = array<i64: 1, 256>}, {pipeline_mode = #tpu.pipeline_mode<synchronous>, transform_indices = @transform_10, window_bounds = array<i64: 3, 128>}, {pipeline_mode = #tpu.pipeline_mode<synchronous>, transform_indices = @transform_11, window_bounds = array<i64: 1, 1>}, {transform_indices = @transform_12, window_bounds = array<i64: 16, 256>}]} {
    %c0_i32 = arith.constant 0 : i32
    %0 = arith.cmpi eq, %arg1, %c0_i32 : i32
    %c0_i32_0 = arith.constant 0 : i32
    %1 = arith.cmpi eq, %arg2, %c0_i32_0 : i32
    %2 = arith.andi %0, %1 : i1
    %3 = arith.extui %2 : i1 to i32
    %c0_i32_1 = arith.constant 0 : i32
    %4 = arith.cmpi ne, %3, %c0_i32_1 : i32
    scf.if %4 {
      %c0 = arith.constant 0 : index
      %c0_5 = arith.constant 0 : index
      %11 = vector.load %arg5[%c0, %c0_5] : memref<16x128xf32, #tpu.memory_space<vmem>>, vector<16x128xf32>
      %c0_6 = arith.constant 0 : index
      %c0_7 = arith.constant 0 : index
      %12 = vector.load %arg4[%c0_6, %c0_7] : memref<16x128xf32, #tpu.memory_space<vmem>>, vector<16x128xf32>
      %c0_8 = arith.constant 0 : index
      %c0_9 = arith.constant 0 : index
      %c0_10 = arith.constant 0 : index
      %13 = vector.load %arg6[%c0_8, %c0_9, %c0_10] : memref<2x16x128xf32, #tpu.memory_space<vmem>>, vector<2x16x128xf32>
      %14 = arith.truncf %11 : vector<16x128xf32> to vector<16x128xbf16>
      %c0_11 = arith.constant 0 : index
      %c0_12 = arith.constant 0 : index
      %15 = vector.load %arg18[%c0_11, %c0_12] : memref<16x128xbf16, #tpu.memory_space<vmem>>, vector<16x128xbf16>
      tpu.vector_store %arg18[%c0_11, %c0_12], %14 {strides = array<i32>} : memref<16x128xbf16, #tpu.memory_space<vmem>>, vector<16x128xbf16>,
      %16 = vector.shape_cast %13 : vector<2x16x128xf32> to vector<32x128xf32>
      %17 = arith.truncf %16 : vector<32x128xf32> to vector<32x128xbf16>
      %c0_13 = arith.constant 0 : index
      %c0_14 = arith.constant 0 : index
      %18 = vector.load %arg8[%c0_13, %c0_14] : memref<128x128xbf16, #tpu.memory_space<vmem>>, vector<128x128xbf16>
      %cst = arith.constant dense<0.000000e+00> : vector<16x128xf32>
      %19 = tpu.matmul %14, %18, %cst {dimension_numbers = #tpu.dot_dimension_numbers<[1], [0], [0], [1], [0, 0, 1, 1], [], []>} : vector<16x128xbf16>, vector<128x128xbf16>, vector<16x128xf32> -> vector<16x128xf32>
      %c0_15 = arith.constant 0 : index
      %c0_16 = arith.constant 0 : index
      %20 = vector.load %arg9[%c0_15, %c0_16] : memref<1x128xf32, #tpu.memory_space<vmem>>, vector<1x128xf32>
      %21 = vector.broadcast %20 : vector<1x128xf32> to vector<16x128xf32>
      %22 = arith.addf %19, %21 : vector<16x128xf32>
      %c0_17 = arith.constant 0 : index
      %c0_18 = arith.constant 0 : index
      %23 = vector.load %arg10[%c0_17, %c0_18] : memref<128x128xbf16, #tpu.memory_space<vmem>>, vector<128x128xbf16>
      %cst_19 = arith.constant dense<0.000000e+00> : vector<32x128xf32>
      %24 = tpu.matmul %17, %23, %cst_19 {dimension_numbers = #tpu.dot_dimension_numbers<[1], [0], [0], [1], [0, 0, 1, 1], [], []>} : vector<32x128xbf16>, vector<128x128xbf16>, vector<32x128xf32> -> vector<32x128xf32>
      %c0_20 = arith.constant 0 : index
      %c0_21 = arith.constant 0 : index
      %25 = vector.load %arg11[%c0_20, %c0_21] : memref<1x128xf32, #tpu.memory_space<vmem>>, vector<1x128xf32>
      %26 = vector.broadcast %25 : vector<1x128xf32> to vector<32x128xf32>
      %27 = arith.addf %24, %26 : vector<32x128xf32>
      %28 = vector.shape_cast %22 : vector<16x128xf32> to vector<2x8x128xf32>
      %29 = arith.truncf %28 : vector<2x8x128xf32> to vector<2x8x128xbf16>
      %30 = vector.shape_cast %27 : vector<32x128xf32> to vector<2x16x128xf32>
      %31 = arith.truncf %30 : vector<2x16x128xf32> to vector<2x16x128xbf16>
      "tpu.trace_start"() <{level = 10 : i32, message = "bqd,bkd->bqk"}> : () -> ()
      %cst_22 = arith.constant dense<0.000000e+00> : vector<2x8x16xf32>
      %32 = tpu.matmul %29, %31, %cst_22 {dimension_numbers = #tpu.dot_dimension_numbers<[2], [2], [1], [1], [0, 0, 0, 1, 1, 1], [0], [0]>} : vector<2x8x128xbf16>, vector<2x16x128xbf16>, vector<2x8x16xf32> -> vector<2x8x16xf32>
      "tpu.trace_stop"() : () -> ()
      %cst_23 = arith.constant 0.0883883461 : f32
      %33 = vector.broadcast %cst_23 : f32 to vector<2x8x16xf32>
      %34 = arith.mulf %32, %33 : vector<2x8x16xf32>
      %cst_24 = arith.constant dense<0xFF800000> : vector<2x8xf32>
      %35 = vector.multi_reduction <maximumf>, %34, %cst_24 [2] : vector<2x8x16xf32> to vector<2x8xf32>
      %36 = vector.shape_cast %35 : vector<2x8xf32> to vector<2x8x1xf32>
      %37 = vector.broadcast %36 : vector<2x8x1xf32> to vector<2x8x16xf32>
      %38 = arith.subf %34, %37 : vector<2x8x16xf32>
      %39 = math.exp %38 : vector<2x8x16xf32>
      %cst_25 = arith.constant dense<0.000000e+00> : vector<2x8xf32>
      %40 = vector.multi_reduction <add>, %39, %cst_25 [2] : vector<2x8x16xf32> to vector<2x8xf32>
      %41 = vector.shape_cast %40 : vector<2x8xf32> to vector<2x8x1xf32>
      %42 = tpu.reciprocal %41 {approx = true} : vector<2x8x1xf32> -> vector<2x8x1xf32>
      %43 = vector.broadcast %42 : vector<2x8x1xf32> to vector<2x8x16xf32>
      %44 = arith.mulf %39, %43 : vector<2x8x16xf32>
      %c0_26 = arith.constant 0 : index
      %c0_27 = arith.constant 0 : index
      %c0_28 = arith.constant 0 : index
      %45 = vector.load %arg17[%c0_26, %c0_27, %c0_28] : memref<2x8x16xf32, #tpu.memory_space<vmem>>, vector<2x8x16xf32>
      tpu.vector_store %arg17[%c0_26, %c0_27, %c0_28], %44 {strides = array<i32>} : memref<2x8x16xf32, #tpu.memory_space<vmem>>, vector<2x8x16xf32>,
      %46 = arith.truncf %44 : vector<2x8x16xf32> to vector<2x8x16xbf16>
      %47 = arith.truncf %13 : vector<2x16x128xf32> to vector<2x16x128xbf16>
      "tpu.trace_start"() <{level = 10 : i32, message = "bqk,bkd->bqd"}> : () -> ()
      %cst_29 = arith.constant dense<0.000000e+00> : vector<2x8x128xf32>
      %48 = tpu.matmul %46, %47, %cst_29 {dimension_numbers = #tpu.dot_dimension_numbers<[2], [1], [1], [2], [0, 0, 0, 1, 1, 2], [0], [0]>} : vector<2x8x16xbf16>, vector<2x16x128xbf16>, vector<2x8x128xf32> -> vector<2x8x128xf32>
      "tpu.trace_stop"() : () -> ()
      %49 = vector.shape_cast %48 : vector<2x8x128xf32> to vector<16x128xf32>
      %c0_30 = arith.constant 0 : index
      %c0_31 = arith.constant 0 : index
      %50 = vector.load %arg14[%c0_30, %c0_31] : memref<3x128xf32, #tpu.memory_space<vmem>>, vector<3x128xf32>
      %51 = vector.extract_strided_slice %50 {offsets = [0, 0], sizes = [1, 128], strides = [1, 1]} : vector<3x128xf32> to vector<1x128xf32>
      %52 = vector.broadcast %51 : vector<1x128xf32> to vector<16x128xf32>
      %53 = arith.mulf %11, %52 : vector<16x128xf32>
      %54 = vector.extract_strided_slice %50 {offsets = [1, 0], sizes = [1, 128], strides = [1, 1]} : vector<3x128xf32> to vector<1x128xf32>
      %55 = vector.broadcast %54 : vector<1x128xf32> to vector<16x128xf32>
      %56 = arith.mulf %49, %55 : vector<16x128xf32>
      %57 = arith.addf %53, %56 : vector<16x128xf32>
      %58 = vector.extract_strided_slice %50 {offsets = [2, 0], sizes = [1, 128], strides = [1, 1]} : vector<3x128xf32> to vector<1x128xf32>
      %59 = vector.broadcast %58 : vector<1x128xf32> to vector<16x128xf32>
      %60 = arith.mulf %12, %59 : vector<16x128xf32>
      %61 = arith.addf %57, %60 : vector<16x128xf32>
      %cst_32 = arith.constant dense<0.000000e+00> : vector<16xf32>
      %62 = vector.multi_reduction <add>, %61, %cst_32 [1] : vector<16x128xf32> to vector<16xf32>
      %63 = vector.shape_cast %62 : vector<16xf32> to vector<16x1xf32>
      %c0_33 = arith.constant 0 : index
      %c0_34 = arith.constant 0 : index
      %64 = vector.load %arg15[%c0_33, %c0_34] : memref<1x1xf32, #tpu.memory_space<vmem>>, vector<1x1xf32>
      %65 = vector.broadcast %64 : vector<1x1xf32> to vector<16x1xf32>
      %66 = arith.addf %63, %65 : vector<16x1xf32>
      %67 = arith.negf %66 : vector<16x1xf32>
      %68 = math.exp %67 : vector<16x1xf32>
      %cst_35 = arith.constant 1.000000e+00 : f32
      %69 = vector.broadcast %cst_35 : f32 to vector<16x1xf32>
      %70 = arith.addf %69, %68 : vector<16x1xf32>
      %71 = arith.divf %69, %70 : vector<16x1xf32>
      %c0_36 = arith.constant 0 : index
      %c0_37 = arith.constant 0 : index
      %72 = vector.load %arg19[%c0_36, %c0_37] : memref<16x1xf32, #tpu.memory_space<vmem>>, vector<16x1xf32>
      tpu.vector_store %arg19[%c0_36, %c0_37], %71 {strides = array<i32>} : memref<16x1xf32, #tpu.memory_space<vmem>>, vector<16x1xf32>,
      %73 = math.log %71 : vector<16x1xf32>
      %c0_38 = arith.constant 0 : index
      %c0_39 = arith.constant 0 : index
      %74 = vector.load %arg20[%c0_38, %c0_39] : memref<16x1xf32, #tpu.memory_space<vmem>>, vector<16x1xf32>
      tpu.vector_store %arg20[%c0_38, %c0_39], %73 {strides = array<i32>} : memref<16x1xf32, #tpu.memory_space<vmem>>, vector<16x1xf32>,
      %cst_40 = arith.constant -1.000000e+30 : f32
      %75 = vector.broadcast %cst_40 : f32 to vector<16x1xf32>
      %c0_41 = arith.constant 0 : index
      %c0_42 = arith.constant 0 : index
      %76 = vector.load %arg21[%c0_41, %c0_42] : memref<16x1xf32, #tpu.memory_space<vmem>>, vector<16x1xf32>
      tpu.vector_store %arg21[%c0_41, %c0_42], %75 {strides = array<i32>} : memref<16x1xf32, #tpu.memory_space<vmem>>, vector<16x1xf32>,
      %cst_43 = arith.constant 0.000000e+00 : f32
      %77 = vector.broadcast %cst_43 : f32 to vector<16x1xf32>
      %c0_44 = arith.constant 0 : index
      %c0_45 = arith.constant 0 : index
      %78 = vector.load %arg22[%c0_44, %c0_45] : memref<16x1xf32, #tpu.memory_space<vmem>>, vector<16x1xf32>
      tpu.vector_store %arg22[%c0_44, %c0_45], %77 {strides = array<i32>} : memref<16x1xf32, #tpu.memory_space<vmem>>, vector<16x1xf32>,
    } else {
    }
    %c0_i32_2 = arith.constant 0 : i32
    %5 = arith.cmpi eq, %arg1, %c0_i32_2 : i32
    %6 = arith.extui %5 : i1 to i32
    %c0_i32_3 = arith.constant 0 : i32
    %7 = arith.cmpi ne, %6, %c0_i32_3 : i32
    scf.if %7 {
      %c0 = arith.constant 0 : index
      %c0_5 = arith.constant 0 : index
      %11 = vector.load %arg18[%c0, %c0_5] : memref<16x128xbf16, #tpu.memory_space<vmem>>, vector<16x128xbf16>
      %c0_6 = arith.constant 0 : index
      %c0_7 = arith.constant 0 : index
      %c0_8 = arith.constant 0 : index
      %12 = vector.load %arg12[%c0_6, %c0_7, %c0_8] : memref<1x128x256xbf16, #tpu.memory_space<vmem>>, vector<1x128x256xbf16>
      %13 = vector.shape_cast %12 : vector<1x128x256xbf16> to vector<128x256xbf16>
      %cst = arith.constant dense<0.000000e+00> : vector<16x256xf32>
      %14 = tpu.matmul %11, %13, %cst {dimension_numbers = #tpu.dot_dimension_numbers<[1], [0], [0], [1], [0, 0, 1, 1], [], []>} : vector<16x128xbf16>, vector<128x256xbf16>, vector<16x256xf32> -> vector<16x256xf32>
      %c0_9 = arith.constant 0 : index
      %c0_10 = arith.constant 0 : index
      %15 = vector.load %arg13[%c0_9, %c0_10] : memref<1x256xf32, #tpu.memory_space<vmem>>, vector<1x256xf32>
      %16 = vector.broadcast %15 : vector<1x256xf32> to vector<16x256xf32>
      %17 = arith.addf %14, %16 : vector<16x256xf32>
      %18 = arith.index_cast %arg2 : i32 to index
      %c0_11 = arith.constant 0 : index
      %c0_12 = arith.constant 0 : index
      %19 = vector.load %arg23[%18, %c0_11, %c0_12] : memref<2x16x256xf32, #tpu.memory_space<vmem>>, vector<1x16x256xf32>
      %20 = vector.shape_cast %19 : vector<1x16x256xf32> to vector<16x256xf32>
      %21 = vector.shape_cast %17 : vector<16x256xf32> to vector<1x16x256xf32>
      tpu.vector_store %arg23[%18, %c0_11, %c0_12], %21 {strides = array<i32>} : memref<2x16x256xf32, #tpu.memory_space<vmem>>, vector<1x16x256xf32>,
      %c0_13 = arith.constant 0 : index
      %c0_14 = arith.constant 0 : index
      %22 = vector.load %arg21[%c0_13, %c0_14] : memref<16x1xf32, #tpu.memory_space<vmem>>, vector<16x1xf32>
      %cst_15 = arith.constant dense<0xFF800000> : vector<16xf32>
      %23 = vector.multi_reduction <maximumf>, %17, %cst_15 [1] : vector<16x256xf32> to vector<16xf32>
      %24 = vector.shape_cast %23 : vector<16xf32> to vector<16x1xf32>
      %25 = arith.maximumf %22, %24 : vector<16x1xf32>
      %c0_16 = arith.constant 0 : index
      %c0_17 = arith.constant 0 : index
      %26 = vector.load %arg22[%c0_16, %c0_17] : memref<16x1xf32, #tpu.memory_space<vmem>>, vector<16x1xf32>
      %27 = arith.subf %22, %25 : vector<16x1xf32>
      %28 = math.exp %27 : vector<16x1xf32>
      %29 = arith.mulf %26, %28 : vector<16x1xf32>
      %30 = vector.broadcast %25 : vector<16x1xf32> to vector<16x256xf32>
      %31 = arith.subf %17, %30 : vector<16x256xf32>
      %32 = math.exp %31 : vector<16x256xf32>
      %cst_18 = arith.constant dense<0.000000e+00> : vector<16xf32>
      %33 = vector.multi_reduction <add>, %32, %cst_18 [1] : vector<16x256xf32> to vector<16xf32>
      %34 = vector.shape_cast %33 : vector<16xf32> to vector<16x1xf32>
      %35 = arith.addf %29, %34 : vector<16x1xf32>
      %c0_19 = arith.constant 0 : index
      %c0_20 = arith.constant 0 : index
      %36 = vector.load %arg22[%c0_19, %c0_20] : memref<16x1xf32, #tpu.memory_space<vmem>>, vector<16x1xf32>
      tpu.vector_store %arg22[%c0_19, %c0_20], %35 {strides = array<i32>} : memref<16x1xf32, #tpu.memory_space<vmem>>, vector<16x1xf32>,
      %c0_21 = arith.constant 0 : index
      %c0_22 = arith.constant 0 : index
      %37 = vector.load %arg21[%c0_21, %c0_22] : memref<16x1xf32, #tpu.memory_space<vmem>>, vector<16x1xf32>
      tpu.vector_store %arg21[%c0_21, %c0_22], %25 {strides = array<i32>} : memref<16x1xf32, #tpu.memory_space<vmem>>, vector<16x1xf32>,
    } else {
    }
    %c1_i32 = arith.constant 1 : i32
    %8 = arith.cmpi eq, %arg1, %c1_i32 : i32
    %9 = arith.extui %8 : i1 to i32
    %c0_i32_4 = arith.constant 0 : i32
    %10 = arith.cmpi ne, %9, %c0_i32_4 : i32
    scf.if %10 {
      %11 = arith.index_cast %arg2 : i32 to index
      %c0 = arith.constant 0 : index
      %c0_5 = arith.constant 0 : index
      %12 = vector.load %arg23[%11, %c0, %c0_5] : memref<2x16x256xf32, #tpu.memory_space<vmem>>, vector<1x16x256xf32>
      %13 = vector.shape_cast %12 : vector<1x16x256xf32> to vector<16x256xf32>
      %c0_6 = arith.constant 0 : index
      %c0_7 = arith.constant 0 : index
      %14 = vector.load %arg21[%c0_6, %c0_7] : memref<16x1xf32, #tpu.memory_space<vmem>>, vector<16x1xf32>
      %c0_8 = arith.constant 0 : index
      %c0_9 = arith.constant 0 : index
      %15 = vector.load %arg22[%c0_8, %c0_9] : memref<16x1xf32, #tpu.memory_space<vmem>>, vector<16x1xf32>
      %16 = math.log %15 : vector<16x1xf32>
      %17 = arith.addf %14, %16 : vector<16x1xf32>
      %18 = vector.broadcast %17 : vector<16x1xf32> to vector<16x256xf32>
      %19 = arith.subf %13, %18 : vector<16x256xf32>
      %20 = arith.index_cast %arg0 : i32 to index
      %21 = arith.index_cast %arg2 : i32 to index
      %22 = memref.load %arg3[%20, %21] : memref<1x2xi32, #tpu.memory_space<smem>>
      %c0_i32_10 = arith.constant 0 : i32
      %23 = arith.cmpi eq, %22, %c0_i32_10 : i32
      %24 = arith.extui %23 : i1 to i32
      %c0_i32_11 = arith.constant 0 : i32
      %25 = arith.cmpi ne, %24, %c0_i32_11 : i32
      scf.if %25 {
        %c0_14 = arith.constant 0 : index
        %c0_15 = arith.constant 0 : index
        %29 = vector.load %arg20[%c0_14, %c0_15] : memref<16x1xf32, #tpu.memory_space<vmem>>, vector<16x1xf32>
        %30 = vector.broadcast %29 : vector<16x1xf32> to vector<16x256xf32>
        %31 = arith.addf %19, %30 : vector<16x256xf32>
        %c0_16 = arith.constant 0 : index
        %c0_17 = arith.constant 0 : index
        %32 = vector.load %arg16[%c0_16, %c0_17] : memref<16x256xf32, #tpu.memory_space<vmem>>, vector<16x256xf32>
        tpu.vector_store %arg16[%c0_16, %c0_17], %31 {strides = array<i32>} : memref<16x256xf32, #tpu.memory_space<vmem>>, vector<16x256xf32>,
      } else {
      }
      %c0_i32_12 = arith.constant 0 : i32
      %26 = arith.cmpi ne, %22, %c0_i32_12 : i32
      %27 = arith.extui %26 : i1 to i32
      %c0_i32_13 = arith.constant 0 : i32
      %28 = arith.cmpi ne, %27, %c0_i32_13 : i32
      scf.if %28 {
        %29 = math.exp %19 : vector<16x256xf32>
        %c256_i32 = arith.constant 256 : i32
        %30 = arith.muli %arg2, %c256_i32 : i32
        %31 = tpu.iota {dimensions = array<i32: 2>} : vector<2x16x256xi32>
        %32 = vector.broadcast %30 : i32 to vector<2x16x256xi32>
        %33 = arith.addi %32, %31 : vector<2x16x256xi32>
        %c0_14 = arith.constant 0 : index
        %c0_15 = arith.constant 0 : index
        %c0_16 = arith.constant 0 : index
        %34 = vector.load %arg7[%c0_14, %c0_15, %c0_16] : memref<2x16x1xi32, #tpu.memory_space<vmem>>, vector<2x16x1xi32>
        %35 = vector.broadcast %34 : vector<2x16x1xi32> to vector<2x16x256xi32>
        %36 = arith.cmpi eq, %35, %33 : vector<2x16x256xi32>
        %37 = arith.extui %36 : vector<2x16x256xi1> to vector<2x16x256xi32>
        %38 = arith.sitofp %37 : vector<2x16x256xi32> to vector<2x16x256xf32>
        %39 = arith.truncf %38 : vector<2x16x256xf32> to vector<2x16x256xbf16>
        %c0_17 = arith.constant 0 : index
        %c0_18 = arith.constant 0 : index
        %c0_19 = arith.constant 0 : index
        %40 = vector.load %arg17[%c0_17, %c0_18, %c0_19] : memref<2x8x16xf32, #tpu.memory_space<vmem>>, vector<2x8x16xf32>
        %41 = arith.truncf %40 : vector<2x8x16xf32> to vector<2x8x16xbf16>
        "tpu.trace_start"() <{level = 10 : i32, message = "bqs,bsv->bqv"}> : () -> ()
        %cst = arith.constant dense<0.000000e+00> : vector<2x8x256xf32>
        %42 = tpu.matmul %41, %39, %cst {dimension_numbers = #tpu.dot_dimension_numbers<[2], [1], [1], [2], [0, 0, 0, 1, 1, 2], [0], [0]>} : vector<2x8x16xbf16>, vector<2x16x256xbf16>, vector<2x8x256xf32> -> vector<2x8x256xf32>
        "tpu.trace_stop"() : () -> ()
        %43 = vector.shape_cast %42 : vector<2x8x256xf32> to vector<16x256xf32>
        %c0_20 = arith.constant 0 : index
        %c0_21 = arith.constant 0 : index
        %44 = vector.load %arg19[%c0_20, %c0_21] : memref<16x1xf32, #tpu.memory_space<vmem>>, vector<16x1xf32>
        %45 = vector.broadcast %44 : vector<16x1xf32> to vector<16x256xf32>
        %46 = arith.mulf %45, %29 : vector<16x256xf32>
        %cst_22 = arith.constant 1.000000e+00 : f32
        %47 = vector.broadcast %cst_22 : f32 to vector<16x1xf32>
        %48 = arith.subf %47, %44 : vector<16x1xf32>
        %49 = vector.broadcast %48 : vector<16x1xf32> to vector<16x256xf32>
        %50 = arith.mulf %49, %43 : vector<16x256xf32>
        %51 = arith.addf %46, %50 : vector<16x256xf32>
        %52 = math.log %51 : vector<16x256xf32>
        %c0_23 = arith.constant 0 : index
        %c0_24 = arith.constant 0 : index
        %53 = vector.load %arg16[%c0_23, %c0_24] : memref<16x256xf32, #tpu.memory_space<vmem>>, vector<16x256xf32>
        tpu.vector_store %arg16[%c0_23, %c0_24], %52 {strides = array<i32>} : memref<16x256xf32, #tpu.memory_space<vmem>>, vector<16x256xf32>,
      } else {
      }
    } else {
    }
    return
  }
  func.func @transform_0(%arg0: i32, %arg1: i32, %arg2: i32, %arg3: memref<1x2xi32, #tpu.memory_space<smem>>) -> (i32, i32) {
    %c0_i32 = arith.constant 0 : i32
    %c0_i32_0 = arith.constant 0 : i32
    return %arg0, %c0_i32 : i32, i32
  }
  func.func @transform_1(%arg0: i32, %arg1: i32, %arg2: i32, %arg3: memref<1x2xi32, #tpu.memory_space<smem>>) -> (i32, i32) {
    %c0_i32 = arith.constant 0 : i32
    %c0_i32_0 = arith.constant 0 : i32
    return %arg0, %c0_i32 : i32, i32
  }
  func.func @transform_2(%arg0: i32, %arg1: i32, %arg2: i32, %arg3: memref<1x2xi32, #tpu.memory_space<smem>>) -> (i32, i32, i32) {
    %c0_i32 = arith.constant 0 : i32
    %c0_i32_0 = arith.constant 0 : i32
    %c0_i32_1 = arith.constant 0 : i32
    return %arg0, %c0_i32, %c0_i32_0 : i32, i32, i32
  }
  func.func @transform_3(%arg0: i32, %arg1: i32, %arg2: i32, %arg3: memref<1x2xi32, #tpu.memory_space<smem>>) -> (i32, i32, i32) {
    %c0_i32 = arith.constant 0 : i32
    %c0_i32_0 = arith.constant 0 : i32
    %c0_i32_1 = arith.constant 0 : i32
    return %arg0, %c0_i32, %c0_i32_0 : i32, i32, i32
  }
  func.func @transform_4(%arg0: i32, %arg1: i32, %arg2: i32, %arg3: memref<1x2xi32, #tpu.memory_space<smem>>) -> (i32, i32) {
    %c0_i32 = arith.constant 0 : i32
    %c0_i32_0 = arith.constant 0 : i32
    %c0_i32_1 = arith.constant 0 : i32
    return %c0_i32, %c0_i32_0 : i32, i32
  }
  func.func @transform_5(%arg0: i32, %arg1: i32, %arg2: i32, %arg3: memref<1x2xi32, #tpu.memory_space<smem>>) -> (i32, i32) {
    %c0_i32 = arith.constant 0 : i32
    %c0_i32_0 = arith.constant 0 : i32
    %c0_i32_1 = arith.constant 0 : i32
    return %c0_i32, %c0_i32_0 : i32, i32
  }
  func.func @transform_6(%arg0: i32, %arg1: i32, %arg2: i32, %arg3: memref<1x2xi32, #tpu.memory_space<smem>>) -> (i32, i32) {
    %c0_i32 = arith.constant 0 : i32
    %c0_i32_0 = arith.constant 0 : i32
    %c0_i32_1 = arith.constant 0 : i32
    return %c0_i32, %c0_i32_0 : i32, i32
  }
  func.func @transform_7(%arg0: i32, %arg1: i32, %arg2: i32, %arg3: memref<1x2xi32, #tpu.memory_space<smem>>) -> (i32, i32) {
    %c0_i32 = arith.constant 0 : i32
    %c0_i32_0 = arith.constant 0 : i32
    %c0_i32_1 = arith.constant 0 : i32
    return %c0_i32, %c0_i32_0 : i32, i32
  }
  func.func @transform_8(%arg0: i32, %arg1: i32, %arg2: i32, %arg3: memref<1x2xi32, #tpu.memory_space<smem>>) -> (i32, i32, i32) {
    %c1_i32 = arith.constant 1 : i32
    %0 = arith.subi %c1_i32, %arg1 : i32
    %1 = arith.muli %arg2, %0 : i32
    %c1_i32_0 = arith.constant 1 : i32
    %2 = arith.muli %c1_i32_0, %arg1 : i32
    %3 = arith.addi %1, %2 : i32
    %c0_i32 = arith.constant 0 : i32
    %c0_i32_1 = arith.constant 0 : i32
    %c0_i32_2 = arith.constant 0 : i32
    return %3, %c0_i32, %c0_i32_1 : i32, i32, i32
  }
  func.func @transform_9(%arg0: i32, %arg1: i32, %arg2: i32, %arg3: memref<1x2xi32, #tpu.memory_space<smem>>) -> (i32, i32) {
    %c1_i32 = arith.constant 1 : i32
    %0 = arith.subi %c1_i32, %arg1 : i32
    %1 = arith.muli %arg2, %0 : i32
    %c1_i32_0 = arith.constant 1 : i32
    %2 = arith.muli %c1_i32_0, %arg1 : i32
    %3 = arith.addi %1, %2 : i32
    %c0_i32 = arith.constant 0 : i32
    %c0_i32_1 = arith.constant 0 : i32
    return %c0_i32, %3 : i32, i32
  }
  func.func @transform_10(%arg0: i32, %arg1: i32, %arg2: i32, %arg3: memref<1x2xi32, #tpu.memory_space<smem>>) -> (i32, i32) {
    %c0_i32 = arith.constant 0 : i32
    %c0_i32_0 = arith.constant 0 : i32
    %c0_i32_1 = arith.constant 0 : i32
    return %c0_i32, %c0_i32_0 : i32, i32
  }
  func.func @transform_11(%arg0: i32, %arg1: i32, %arg2: i32, %arg3: memref<1x2xi32, #tpu.memory_space<smem>>) -> (i32, i32) {
    %c0_i32 = arith.constant 0 : i32
    %c0_i32_0 = arith.constant 0 : i32
    %c0_i32_1 = arith.constant 0 : i32
    return %c0_i32, %c0_i32_0 : i32, i32
  }
  func.func @transform_12(%arg0: i32, %arg1: i32, %arg2: i32, %arg3: memref<1x2xi32, #tpu.memory_space<smem>>) -> (i32, i32) {
    %0 = arith.muli %arg2, %arg1 : i32
    %c0_i32 = arith.constant 0 : i32
    return %arg0, %0 : i32, i32
  }
}

</mosaic_0001>

<bundles_post_ra>
// kernel: tpu_custom_call.1
= control target key start
LH: loop header
LB: loop body
LE: loop exit
PB: predicated region body
PF: predicated region fallthrough
CT: control target
= control target key end

     0   :  { %s3378_s0 = inlined_call_operand.hbm [shape: s32[1,2], index: 0, kind: input, shape index: {}]   ;;  %s3379_s1 = inlined_call_operand.hbm [shape: f32[16,128], index: 1, kind: input, shape index: {}]   ;;  %s3380_s2 = inlined_call_operand.hbm [shape: f32[16,128], index: 2, kind: input, shape index: {}]   ;;  %s3381_s3 = inlined_call_operand.hbm [shape: f32[2,16,128], index: 3, kind: input, shape index: {}]   ;;  %s3382_s4 = inlined_call_operand.vmem [shape: s32[2,16,1], index: 4, kind: input, shape index: {}]   ;;  %s3383_s5 = inlined_call_operand.hbm [shape: bf16[128,128], index: 5, kind: input, shape index: {}]   ;;  %s3384_s6 = inlined_call_operand.hbm [shape: f32[1,128], index: 6, kind: input, shape index: {}]   ;;  %s3385_s7 = inlined_call_operand.vmem [shape: bf16[128,128], index: 7, kind: input, shape index: {}]   ;;  %s3386_s8 = inlined_call_operand.hbm [shape: f32[1,128], index: 8, kind: input, shape index: {}]   ;;  %s3387_s9 = inlined_call_operand.hbm [shape: bf16[2,128,256], index: 9, kind: input, shape index: {}]   ;;  %s3388_s10 = inlined_call_operand.vmem [shape: f32[1,512], index: 10, kind: input, shape index: {}]   ;;  %s3389_s11 = inlined_call_operand.vmem [shape: f32[3,128], index: 11, kind: input, shape index: {}]   ;;  %s3390_s13 = inlined_call_operand.hbm [shape: f32[16,512], index: 13, kind: output, shape index: {}]   ;;  %s3391_s12 = inlined_call_operand.<no memory space> [shape: f32[1,1], index: 12, kind: input, shape index: {}]  }
   0x1   :  { %3407 = sst [smem:[#allocation36_spill]] %s3379_s1  ;;  %s2318_s27 = scalar_lea.hbm %s3378_s0, 16 }
   0x2   :  { %3408 = sst [smem:[#allocation37_spill]] %s3380_s2  ;;  %p2319_p0 = scmp.ne.s32.totalorder %s3378_s0, %s2318_s27 }
   0x3   :  { %3409 = sst [smem:[#allocation38_spill]] %s3381_s3  ;;  %p2322_p1 = scmp.lt.u32.totalorder %s2318_s27, %s3378_s0 }
   0x4   :  { %3410 = sst [smem:[#allocation39_spill]] %s3382_s4 }
   0x5   :  { %3411 = sst [smem:[#allocation40_spill]] %s3383_s5  ;;  %p2324_p2 = pnand %p2322_p1, %p2319_p0 }
   0x6   :  { %3412 = sst [smem:[#allocation41_spill]] %s3384_s6 }
   0x7   :  { %3413 = sst [smem:[#allocation42_spill]] %s3385_s7 }
   0x8   :  { %3414 = sst [smem:[#allocation43_spill]] %s3386_s8 }
   0x9   :  { %3415 = sst [smem:[#allocation44_spill]] %s3387_s9 }
   0xa   :  { %3416 = sst [smem:[#allocation45_spill]] %s3388_s10 }
   0xb   :  { %3417 = sst [smem:[#allocation46_spill]] %s3389_s11 }
   0xc   :  { %3418 = sst [smem:[#allocation47_spill]] %s3390_s13 }
   0xd   :  { %2327 = shalt.err (!%p2324_p2)  }
   0xe   :  { %s2668_s15 = smov [#allocation10]   ;;  %v20_v0 = vstv %s3391_s12 }
   0xf   :  { %19 = dma.hbm_to_smem %s3378_s0, 16, %s2668_s15, [#allocation9]  ;;  %21 = vst [vmem:[#allocation11] sm:$0x1] %v20_v0 }
  0x10   :  { %2598 = dma.done.wait [#allocation9], 16 }
  0x11   :  { %2599 = vsyncadd [#allocation9], 4294967280 }
  0x12   :  { %23 = sfence }
  0x13   :  { %24 = vsyncpa [#allocation13], 0 }
  0x14   :  { %25 = vsyncpa [#allocation16], 0 }
  0x15   :  { %26 = vsyncpa [#allocation19], 0 }
  0x16   :  { %27 = vsyncpa [#allocation22], 0 }
  0x17   :  { %28 = vsyncpa [#allocation14], 0 }
  0x18   :  { %30 = vsyncpa [#allocation14 + $0x1], 0  ;;  %s2777_s20 = smov 0   ;;  %s2779_s21 = smov 0  }
  0x19   :  { %s2781_s22 = smov 0   ;;  %s2783_s0 = smov 0  }
  0x1a   :  { %s2785_s23 = smov 0   ;;  %s2787_s12 = smov 0  }
  0x1b   :  { %s2789_s24 = smov 0   ;;  %s2791_s25 = smov 0  }
  0x1c   :  { %s2793_s26 = smov 0   ;;  %s2795_s27 = smov 0  }
  0x1d   :  { %s2797_s28 = smov 0  }
  0x1e LB: > { %3419 = sst [smem:[#allocation32_spill]] %s2626_s20  ;;  %s2833_s29 = sadd.s32 4294967295, %s2666_s28   ;;  %s2666_s28 = sphi %s2797_s28, %s36_s28   ;;  %s2662_s27 = sphi %s2795_s27, %s3482_s27   ;;  %s2658_s26 = sphi %s2793_s26, %s3481_s26   ;;  %s2654_s25 = sphi %s2791_s25, %s3480_s25   ;;  %s2650_s24 = sphi %s2789_s24, %s3479_s24   ;;  %s2646_s12 = sphi %s2787_s12, %s3478_s12   ;;  %s2642_s23 = sphi %s2785_s23, %s3477_s23   ;;  %s2638_s0 = sphi %s2783_s0, %s3476_s0   ;;  %s2634_s22 = sphi %s2781_s22, %s3475_s22   ;;  %s2630_s21 = sphi %s2779_s21, %s3474_s21   ;;  %s2626_s20 = sphi %s2777_s20, %s3473_s20  }
  0x1f   : > { %3420 = sst [smem:[#allocation33_spill]] %s2650_s24  ;;  %p1852_p3 = scmp.ge.s32.totalorder %s2666_s28, 1 }
  0x20   : > { %3421 = sst [smem:[#allocation34_spill]] %s2654_s25  ;;  %p3404_p4 = scmp.eq.s32.totalorder %s2833_s29, 0 }
  0x21   : > { %p384_p6 = scmp.lt.s32.totalorder %s2666_s28, 5  ;;  %s2669_s14 = smov [#allocation12]  }
  0x22   : > { %s399_s15 = sshll.u32 %s2669_s14, 4  ;;  %s2670_s17 = smov [#allocation15]   ;;  %s2843_s15 = int_to_ptr.vmem [resolvable:$true] %s399_s15 }
  0x23   : > { %p2839_p7 = pnand %p1852_p3, %p384_p6  ;;  %s415_s18 = sshll.u32 %s2670_s17, 4  ;;  %s2853_s18 = int_to_ptr.vmem [resolvable:$true] %s415_s18 }
  0x24   : > { %s2671_s19 = smov [#allocation18]   ;;  %s3425_s1 = sld [smem:[#allocation36_spill]] }
  0x25   : > { %s3422_s30 = scalar_select %p2839_p7, 1, 0 }
  0x26   : > { %p2069_p8 = pneg %p2839_p7  ;;  %s455_s13 = sshll.u32 %s2671_s19, 4  ;;  %s2855_s13 = int_to_ptr.vmem [resolvable:$true] %s455_s13 }
  0x27   : > { %3423 = sst [smem:[#allocation35_spill]] %s3422_s30 }
  0x28   : > { %p2849_p9 = pnand %p2069_p8, %p3404_p4 }
  0x2a   : > { %s2328_s11 = scalar_lea.hbm %s3425_s1, 256  ;;  %p2865_p11 = pneg %p2849_p9 }
  0x2b   : > { %p2329_p10 = scmp.ne.s32.totalorder %s3425_s1, %s2328_s11  ;;  %p2335_p0 = scmp.lt.u32.totalorder %s2328_s11, %s3425_s1 }
  0x2d   : > { %p2331_p12 = pnand %p2865_p11, %p2329_p10 }
  0x2f   : > { %p2332_p13 = pneg %p2331_p12 }
  0x31   : > { %p2337_p1 = pnand %p2335_p0, %p2332_p13 }
  0x33   : > { %2340 = shalt.err (!%p2337_p1)
}
  0x34   : > { %s2341_s4 = scalar_lea.vmem %s2843_s15, 256  ;;  %p2349_p8 = scmp.lt.s32.totalorder %s2843_s15, %s2843_s15 }
  0x35   : > { %p2342_p2 = scmp.ne.s32.totalorder %s2843_s15, %s2341_s4  ;;  %p2350_p5 = scmp.lt.s32.totalorder %s2341_s4, %s2341_s4 }
  0x37   : > { %p2344_p3 = pnand %p2342_p2, %p2865_p11  ;;  %p2351_p10 = por %p2350_p5, %p2349_p8 }
  0x39   : > { %p2345_p6 = pneg %p2344_p3 }
  0x3b   : > { %p2352_p12 = pnand %p2351_p10, %p2345_p6 }
  0x3d   : > { %2355 = shalt.err (!%p2352_p12)
}
  0x3e   : > { %s3400_s7 = smov 128   ;;  %s3402_s10 = smov 8  }
  0x3f   : > { %2072 = dma.hbm_to_vmem [thread:$0]  (!%p2849_p9), %s3425_s1, 256, %s2843_s15, [#allocation13], %s3400_s7, %s3400_s7, %s3402_s10  }
  0x40   : > { %s3427_s2 = sld [smem:[#allocation37_spill]] }
  0x46   : > { %s2356_s4 = scalar_lea.hbm %s3427_s2, 256 }
  0x47   : > { %p2357_p5 = scmp.ne.s32.totalorder %s3427_s2, %s2356_s4  ;;  %p2363_p1 = scmp.lt.u32.totalorder %s2356_s4, %s3427_s2 }
  0x49   : > { %p2359_p13 = pnand %p2357_p5, %p2865_p11 }
  0x4b   : > { %p2360_p0 = pneg %p2359_p13 }
  0x4d   : > { %p2365_p2 = pnand %p2363_p1, %p2360_p0 }
  0x4f   : > { %2368 = shalt.err (!%p2365_p2)
}
  0x50   : > { %s2369_s15 = scalar_lea.vmem %s2853_s18, 256  ;;  %p2377_p10 = scmp.lt.s32.totalorder %s2853_s18, %s2853_s18 }
  0x51   : > { %p2370_p3 = scmp.ne.s32.totalorder %s2853_s18, %s2369_s15  ;;  %p2378_p12 = scmp.lt.s32.totalorder %s2369_s15, %s2369_s15 }
  0x53   : > { %p2372_p6 = pnand %p2370_p3, %p2865_p11  ;;  %p2379_p5 = por %p2378_p12, %p2377_p10 }
  0x55   : > { %p2373_p8 = pneg %p2372_p6 }
  0x57   : > { %p2380_p13 = pnand %p2379_p5, %p2373_p8 }
  0x59   : > { %2383 = shalt.err (!%p2380_p13)
}
  0x5a   : > { %2075 = dma.hbm_to_vmem [thread:$0]  (!%p2849_p9), %s3427_s2, 256, %s2853_s18, [#allocation16], %s3400_s7, %s3400_s7, %s3402_s10  }
  0x5b   : > { %s3428_s5 = sld [smem:[#allocation40_spill]] }
  0x61   : > { %s2384_s11 = scalar_lea.hbm %s3428_s5, 1024 }
  0x62   : > { %p2385_p0 = scmp.ne.s32.totalorder %s3428_s5, %s2384_s11  ;;  %p2391_p3 = scmp.lt.u32.totalorder %s2384_s11, %s3428_s5 }
  0x64   : > { %p2387_p1 = pnand %p2385_p0, %p2865_p11 }
  0x66   : > { %p2388_p2 = pneg %p2387_p1 }
  0x68   : > { %p2393_p6 = pnand %p2391_p3, %p2388_p2 }
  0x6a   : > { %2396 = shalt.err (!%p2393_p6)
}
  0x6b   : > { %s2397_s18 = scalar_lea.vmem %s2855_s13, 1024  ;;  %p2405_p5 = scmp.lt.s32.totalorder %s2855_s13, %s2855_s13 }
  0x6c   : > { %p2398_p8 = scmp.ne.s32.totalorder %s2855_s13, %s2397_s18  ;;  %p2406_p13 = scmp.lt.s32.totalorder %s2397_s18, %s2397_s18 }
  0x6e   : > { %p2400_p10 = pnand %p2398_p8, %p2865_p11  ;;  %p2407_p0 = por %p2406_p13, %p2405_p5 }
  0x70   : > { %p2401_p12 = pneg %p2400_p10 }
  0x72   : > { %p2408_p1 = pnand %p2407_p0, %p2401_p12 }
  0x74   : > { %2411 = shalt.err (!%p2408_p1)
}
  0x75   : > { %s2674_s15 = smov 64   ;;  %s2675_s9 = smov 4  }
  0x76   : > { %2081 = dma.hbm_to_vmem [thread:$0]  (!%p2849_p9), %s3428_s5, 1024, %s2855_s13, [#allocation19], %s2674_s15, %s2674_s15, %s2675_s9  }
  0x77   : > { %s2676_s30 = smov [#allocation17]   ;;  %s2677_s14 = smov [#allocation20]  }
  0x78   : > { %s432_s11 = sshll.u32 %s2676_s30, 4  ;;  %s469_s17 = sshll.u32 %s2677_s14, 4  ;;  %s433_s11 = int_to_ptr.vmem [resolvable:$true] %s432_s11  ;;  %s2938_s17 = int_to_ptr.vmem [resolvable:$true] %s469_s17 }
  0x79   : > { %s3429_s3 = sld [smem:[#allocation38_spill]] }
  0x7f   : > { %s2412_s18 = scalar_lea.hbm %s3429_s3, 512 }
  0x80   : > { %p2413_p2 = scmp.ne.s32.totalorder %s3429_s3, %s2412_s18  ;;  %p2419_p8 = scmp.lt.u32.totalorder %s2412_s18, %s3429_s3 }
  0x82   : > { %p2415_p3 = pnand %p2413_p2, %p2865_p11 }
  0x84   : > { %p2416_p6 = pneg %p2415_p3 }
  0x86   : > { %p2421_p10 = pnand %p2419_p8, %p2416_p6 }
  0x88   : > { %2424 = shalt.err (!%p2421_p10)
}
  0x89   : > { %s2425_s15 = scalar_lea.vmem %s433_s11, 512  ;;  %p2433_p0 = scmp.lt.s32.totalorder %s433_s11, %s433_s11 }
  0x8a   : > { %p2426_p12 = scmp.ne.s32.totalorder %s433_s11, %s2425_s15  ;;  %p2434_p1 = scmp.lt.s32.totalorder %s2425_s15, %s2425_s15 }
  0x8c   : > { %p2428_p5 = pnand %p2426_p12, %p2865_p11  ;;  %p2435_p4 = por %p2434_p1, %p2433_p0 }
  0x8e   : > { %p2429_p13 = pneg %p2428_p5 }
  0x90   : > { %p2436_p7 = pnand %p2435_p4, %p2429_p13 }
  0x92   : > { %2439 = shalt.err (!%p2436_p7)
}
  0x93   : > { %s3430_s7 = smov 8   ;;  %s3431_s10 = smov 128  }
  0x94   : > { %2078 = dma.hbm_to_vmem [thread:$0]  (!%p2849_p9), %s3429_s3, 512, %s433_s11, [#allocation16], %s3431_s10, %s3431_s10, %s3430_s7  }
  0x95   : > { %s3432_s6 = sld [smem:[#allocation41_spill]] }
  0x9b   : > { %s2440_s19 = scalar_lea.hbm %s3432_s6, 16 }
  0x9c   : > { %p2441_p2 = scmp.ne.s32.totalorder %s3432_s6, %s2440_s19  ;;  %p2447_p3 = scmp.lt.u32.totalorder %s2440_s19, %s3432_s6 }
  0x9e   : > { %p2443_p4 = pnand %p2441_p2, %p2865_p11 }
  0xa0   : > { %p2444_p7 = pneg %p2443_p4 }
  0xa2   : > { %p2449_p6 = pnand %p2447_p3, %p2444_p7 }
  0xa4   : > { %2452 = shalt.err (!%p2449_p6)
}
  0xa5   : > { %s2453_s11 = scalar_lea.vmem %s2938_s17, 16  ;;  %s2460_s15 = scalar_lea.vmem %s2938_s17, 32 }
  0xa6   : > { %p2454_p8 = scmp.ne.s32.totalorder %s2938_s17, %s2453_s11  ;;  %p2461_p5 = scmp.lt.s32.totalorder %s2938_s17, %s2938_s17 }
  0xa7   : > { %p2462_p13 = scmp.lt.s32.totalorder %s2460_s15, %s2453_s11 }
  0xa8   : > { %p2456_p10 = pnand %p2454_p8, %p2865_p11 }
  0xa9   : > { %p2463_p0 = por %p2462_p13, %p2461_p5 }
  0xaa   : > { %p2457_p12 = pneg %p2456_p10 }
  0xac   : > { %p2464_p1 = pnand %p2463_p0, %p2457_p12 }
  0xae   : > { %2467 = shalt.err (!%p2464_p1)
}
  0xaf   : > { %2084 = dma.hbm_to_vmem [thread:$0]  (!%p2849_p9), %s3432_s6, 16, %s2938_s17, [#allocation19]  }
  0xb0   : > { %s2678_s30 = smov [#allocation21]   ;;  %s3433_s8 = sld [smem:[#allocation43_spill]] }
  0xb1   : > { %s483_s14 = sshll.u32 %s2678_s30, 4  ;;  %s484_s14 = int_to_ptr.vmem [resolvable:$true] %s483_s14 }
  0xb6   : > { %s2468_s18 = scalar_lea.hbm %s3433_s8, 16 }
  0xb7   : > { %p2469_p2 = scmp.ne.s32.totalorder %s3433_s8, %s2468_s18  ;;  %p2475_p3 = scmp.lt.u32.totalorder %s2468_s18, %s3433_s8 }
  0xb9   : > { %p2471_p4 = pnand %p2469_p2, %p2865_p11 }
  0xbb   : > { %p2472_p7 = pneg %p2471_p4 }
  0xbd   : > { %p2477_p6 = pnand %p2475_p3, %p2472_p7 }
  0xbf   : > { %2480 = shalt.err (!%p2477_p6)
}
  0xc0   : > { %s2481_s17 = scalar_lea.vmem %s484_s14, 16  ;;  %s2488_s9 = scalar_lea.vmem %s484_s14, 32 }
  0xc1   : > { %p2482_p8 = scmp.ne.s32.totalorder %s484_s14, %s2481_s17  ;;  %p2489_p5 = scmp.lt.s32.totalorder %s484_s14, %s484_s14 }
  0xc2   : > { %p2490_p13 = scmp.lt.s32.totalorder %s2488_s9, %s2481_s17 }
  0xc3   : > { %p2484_p10 = pnand %p2482_p8, %p2865_p11 }
  0xc4   : > { %p2491_p0 = por %p2490_p13, %p2489_p5 }
  0xc5   : > { %p2485_p12 = pneg %p2484_p10 }
  0xc7   : > { %p2492_p1 = pnand %p2491_p0, %p2485_p12 }
  0xc9   : > { %2495 = shalt.err (!%p2492_p1)
}
  0xca   : > { %2087 = dma.hbm_to_vmem [thread:$0]  (!%p2849_p9), %s3433_s8, 16, %s484_s14, [#allocation22]  }
  0xcb   : > { %s48_s16 = sadd.s32 1, %s2658_s26  ;;  %s51_s19 = sadd.s32 1, %s2662_s27 }
  0xcc   : > { %p49_p11 = scmp.ge.s32.totalorder %s48_s16, 2  ;;  %s247_s4 = ssub.s32 1, %s2662_s27 }
  0xcd   : > { %s248_s18 = smul.u32 %s2658_s26, %s247_s4  ;;  %s256_s20 = sadd.s32 1, %s2646_s12 }
  0xce   : > { %s3484_s16 = smov (%p49_p11, %s48_s16), 0  ;;  %s3486_s19 = smov (!%p49_p11, %s51_s19), %s2662_s27 }
  0xcf   : > { %s3013_s13 = sadd.s32 %s2662_s27, %s248_s18  ;;  %p263_p2 = scmp.ne.s32.totalorder %s2646_s12, %s2642_s23 }
  0xd0   : > { %p53_p9 = scmp.ge.s32.totalorder %s3486_s19, 2  ;;  %p264_p4 = scmp.eq.s32.totalorder %s2666_s28, 0 }
  0xd1   : > { %p269_p7 = scmp.ne.s32.totalorder %s2642_s23, %s2638_s0  ;;  %s3434_s14 = sld [smem:[#allocation32_spill]] }
  0xd2   : > { %s353_s11 = smul.u32 %s2658_s26, %s2662_s27  ;;  %s3488_s19 = smov (%p53_p9, %s3486_s19), 0 }
  0xd3   : > { %p3024_p3 = por %p264_p4, %p263_p2  ;;  %p3436_p6 = scmp.eq.s32.totalorder %s2833_s29, 0 }
  0xd4   : > { %s250_s0 = ssub.s32 1, %s3488_s19  ;;  %s354_s9 = smul.u32 %s3488_s19, %s3484_s16 }
  0xd5   : > { %p3030_p8 = por %p3436_p6, %p269_p7  ;;  %s251_s25 = smul.u32 %s250_s0, %s3484_s16 }
  0xd6   : > { %s360_s30 = sadd.s32 1, %s2634_s22  ;;  %s356_s4 = ssub.s32 %s353_s11, %s354_s9 }
  0xd7   : > { %p370_p10 = scmp.ne.s32.totalorder %s2634_s22, %s2630_s21  ;;  %s252_s18 = sadd.s32 %s251_s25, %s3488_s19 }
  0xd8   : > { %p358_p12 = scmp.eq.s32.totalorder %s356_s4, 0  ;;  %s253_s24 = ssub.s32 %s3013_s13, %s252_s18 }
  0xd9   : > { %p3438_p5 = scmp.eq.s32.totalorder %s2833_s29, 3  ;;  %p254_p0 = scmp.eq.s32.totalorder %s253_s24, 0 }
  0xda   : > { %p376_p1 = scmp.ne.s32.totalorder %s2630_s21, %s3434_s14  ;;  %s3440_s0 = sadd.s32 4294967294, %s2666_s28  }
  0xdb   : > { %p3045_p13 = por %p3438_p5, %p370_p10  ;;  %p377_p11 = scmp.eq.s32.totalorder %s3440_s0, 3 }
  0xdc   : > { %s3052_s2 = scalar_select %p358_p12, %s2634_s22, %s360_s30  }
  0xdd   : > { %s3439_s1 = scalar_select %p3045_p13, 1, 0 }
  0xde   : > { %s3055_s3 = scalar_select %p254_p0, %s2646_s12, %s256_s20  }
  0xdf   : > { %p2102_p2 = scmp.lt.s32.totalorder %s2666_s28, 4  ;;  %s500_s11 = sand.u32 1, %s2666_s28  }
  0xe0   : > { %s502_s9 = sand.u32 1, %s2646_s12   ;;  %p3062_p9 = por %p377_p11, %p376_p1 }
  0xe1   : > { %s1861_s4 = sshll.u32 %s502_s9, 7  ;;  %s1946_s18 = sshll.u32 %s3013_s13, 11 }
  0xe2   : > { %s3441_s25 = scalar_select %p3062_p9, 1, 0 }
  0xe3   : > { %s3442_s8 = sld [smem:[#allocation44_spill]]  ;;  %s504_s20 = scalar_lea.vmem [#allocation23], %s1861_s4 }
  0xe4   : > { %s514_s14 = sshll.u32 %s504_s20, 4  ;;  %p3074_p4 = pnand %p2102_p2, %p3024_p3  ;;  %s3078_s14 = int_to_ptr.vmem [resolvable:$true] %s514_s14 }
  0xe5   : > { %s3080_s13 = scalar_lea.sflag [#allocation13], %s500_s11 }
  0xe6   : > { %p2498_p6 = pneg %p3074_p4 }
  0xe9   : > { %s3070_s24 = scalar_lea.hbm %s3442_s8, %s1946_s18  ;;  %s2501_s0 = scalar_lea.hbm %s3442_s8, 4096 }
  0xea   : > { %s2496_s5 = scalar_lea.hbm %s3070_s24, 2048  ;;  %p2502_p3 = scmp.lt.u32.totalorder %s3070_s24, %s3442_s8 }
  0xeb   : > { %p2497_p7 = scmp.ne.s32.totalorder %s3070_s24, %s2496_s5  ;;  %p2503_p5 = scmp.lt.u32.totalorder %s2501_s0, %s2496_s5 }
  0xec   : > { %p2505_p1 = scmp.lt.u32.totalorder %s2496_s5, %s3070_s24 }
  0xed   : > { %p2499_p10 = pnand %p2498_p6, %p2497_p7  ;;  %p2504_p0 = por %p2503_p5, %p2502_p3 }
  0xef   : > { %p2500_p12 = pneg %p2499_p10  ;;  %p2506_p11 = por %p2505_p1, %p2504_p0 }
  0xf1   : > { %p2507_p2 = pnand %p2506_p11, %p2500_p12 }
  0xf3   : > { %2510 = shalt.err (!%p2507_p2)
}
  0xf4   : > { %s2511_s11 = scalar_lea.vmem %s3078_s14, 2048  ;;  %s2679_s18 = smov [#allocation23]  }
  0xf5   : > { %p2512_p7 = scmp.ne.s32.totalorder %s3078_s14, %s2511_s11  ;;  %s2516_s20 = sshll.u32 %s2679_s18, 4  ;;  %s2517_s20 = int_to_ptr.vmem [resolvable:$false] %s2516_s20 }
  0xf6   : > { %s2518_s6 = scalar_lea.vmem %s2517_s20, 4096  ;;  %p2519_p13 = scmp.lt.s32.totalorder %s3078_s14, %s2517_s20 }
  0xf7   : > { %p2514_p10 = pnand %p2512_p7, %p2498_p6  ;;  %p2520_p3 = scmp.lt.s32.totalorder %s2518_s6, %s2511_s11 }
  0xf9   : > { %p2515_p9 = pneg %p2514_p10  ;;  %p2521_p5 = por %p2520_p3, %p2519_p13 }
  0xfb   : > { %p2522_p0 = pnand %p2521_p5, %p2515_p9 }
  0xfd   : > { %2525 = shalt.err (!%p2522_p0)
}
  0xfe   : > { %2091 = dma.hbm_to_vmem [thread:$0]  (!%p3074_p4), %s3070_s24, 2048, %s3078_s14, %s3080_s13, %s3431_s10, %s3431_s10, %s3430_s7  }
  0xff   : > { %s3444_s5 = sld [smem:[#allocation35_spill]] }
 0x105   : > { %p3445_p6 = scmp.ne.s32.totalorder %s3444_s5, 0 }
 0x106   : > { %p3446_p12 = scmp.eq.s32.totalorder (!%p3445_p6), %s2833_s29, 0 }
 0x107   : > { %540 = sbr.rel (%p3445_p6) target bundleno = 2769 (0xad1), region = 68 }
 0x10e   : > { %2601 = dma.done.wait (%p3446_p12), [#allocation13], 256   ;;  %p3447_p1 = pmov %p3446_p12 }
 0x110   : > { %2603 = vsyncadd (%p3447_p1), [#allocation13], 4294967040  ;;  %p3448_p13 = pmov %p3447_p1 }
 0x111   : > { %p3449_p9 = pmov %p3447_p1 }
 0x112   : > { %2605 = dma.done.wait (%p3448_p13), [#allocation16], 768  }
 0x113   : > { %2607 = vsyncadd (%p3449_p9), [#allocation16], 4294966528  ;;  %p3450_p11 = pmov %p3447_p1 }
 0x114   : > { %p3451_p4 = pmov %p3447_p1 }
 0x115   : > { %2609 = dma.done.wait (%p3450_p11), [#allocation19], 1040  }
 0x116   : > { %2611 = vsyncadd (%p3451_p4), [#allocation19], 4294966256  ;;  %p3452_p2 = pmov %p3447_p1 }
 0x117   : > { %p3453_p7 = pmov %p3447_p1 }
 0x118   : > { %2613 = dma.done.wait (%p3452_p2), [#allocation22], 16  }
 0x119   : > { %2615 = vsyncadd (%p3453_p7), [#allocation22], 4294967280  ;;  %s566_s7 = sand.u32 1, %s2833_s29   ;;  %s568_s10 = sand.u32 1, %s2642_s23  }
 0x11a   : > { %s1871_s24 = sshll.u32 %s568_s10, 7  ;;  %s567_s14 = scalar_lea.sflag [#allocation13], %s566_s7 }
 0x11b   : > { %s3131_s30 = scalar_lea.vmem [#allocation23], %s1871_s24 }
 0x11c   : > { %2617 = dma.done.wait (%p3030_p8), %s567_s14, 2048  }
 0x11d   : > { %2619 = vsyncadd (%p3030_p8), %s567_s14, 4294965248  ;;  %s3454_s13 = sld [smem:[#allocation34_spill]]  ;;  %s3455_s15 = sld [smem:[#allocation33_spill]] }
 0x11e   : > { %s621_s0 = sand.u32 1, %s2630_s21   ;;  %s3456_s6 = sld [smem:[#allocation45_spill]] }
 0x11f   : > { %s1872_s29 = sshll.u32 %s621_s0, 5 }
 0x120   : > { %s3151_s7 = scalar_lea.vmem [#allocation24], %s1872_s29 }
 0x123   : > { %s637_s9 = ssub.s32 1, %s3454_s13  ;;  %p652_p10 = scmp.eq.s32.totalorder %s3454_s13, 0 }
 0x124   : > { %s638_s4 = smul.u32 %s3455_s15, %s637_s9  ;;  %p653_p3 = scmp.eq.s32.totalorder %s3455_s15, 0 }
 0x126   : > { %s639_s11 = sadd.s32 %s3454_s13, %s638_s4  ;;  %p654_p0 = pnand %p653_p3, %p652_p10 }
 0x127   : > { %s1873_s18 = sshll.u32 %s639_s11, 1  ;;  %s3457_s14 = sld [smem:[#allocation42_spill]] (!%p654_p0)  ;;  %v2680_v3 = vmov (!%p654_p0), 0.0   ;;  %v2222_v4 = vld [vmem:[#allocation18] sm:$0xff] (!%p654_p0)   ;;  %vm2681_vm0 = vmmov (!%p654_p0), 0   ;;  %v2224_v6 = vld [vmem:[#allocation18 + $0x8] sm:$0xff] (!%p654_p0)  }
 0x128   : > { %p641_p5 = scmp.lt.s32.totalorder %s1873_s18, 3  ;;  %657 = sbr.rel (%p654_p0) target bundleno = 1496 (0x5d8), region = 100  ;;  %1977 = vmatprep.subr.bf16.mxu0 (!%p654_p0), %v2680_v3  ;;  %1993 = vmatprep.mubr.msk.bf16.mxu0 (!%p654_p0), %vm2681_vm0, %v2680_v3  ;;  %v2226_v8 = vld [vmem:[#allocation18 + $0x10] sm:$0xff] (!%p654_p0)   ;;  %v2228_v10 = vld [vmem:[#allocation18 + $0x18] sm:$0xff] (!%p654_p0)   ;;  %v662_v11 = vld [vmem:[#allocation17] sm:$0xff] (!%p654_p0)  ;;  %vm988_vm1 = vcmask (!%p654_p0), 130048  }
 0x129   : > { %1978 = vmatpush3.bf16.msra.mxu0 (!%p654_p0), %v2222_v4  ;;  %v663_v12 = vld [vmem:[#allocation17 + $0x8] sm:$0xff] (!%p654_p0)  ;;  %v2230_v15 = vld [vmem:[#allocation18 + $0x20] sm:$0xff] (!%p654_p0)   ;;  %v3181_v16 = vld [vmem:[#allocation15] sm:$0xff] (!%p654_p0)  ;;  %vm1149_vm2 = vcmask (!%p654_p0), 7168   ;;  %s3458_s11 = sld [smem:[#allocation46_spill]] (!%p654_p0) }
 0x12a   : > { %s3490_s18 = smov (!%p641_p5, %s1873_s18), 3  ;;  %1979 = vmatprep.subr.bf16.mxu0 (!%p654_p0), %v2680_v3  ;;  %v3177_v14 = vpack.c.bf16 (!%p654_p0), %v663_v12, %v662_v11  ;;  %v3183_v17 = vld [vmem:[#allocation15 + $0x8] sm:$0xff] (!%p654_p0)  ;;  %v2232_v20 = vld [vmem:[#allocation18 + $0x28] sm:$0xff] (!%p654_p0)   ;;  %v2234_v22 = vld [vmem:[#allocation18 + $0x30] sm:$0xff] (!%p654_p0)   ;;  %1160 = vst.msk [vmem:[#allocation7] sm:$0xff] (!%p654_p0), %vm1149_vm2, %v2680_v3 }
 0x12b   : > { %s643_s5 = scalar_lea.vmem %s3456_s6, %s3490_s18  ;;  %v666_v18 = vpack.c.bf16 (!%p654_p0), %v3183_v17, %v3181_v16  ;;  %v664_v23 = vld [vmem:[#allocation17 + $0x10] sm:$0xff] (!%p654_p0)  ;;  %v665_v24 = vld [vmem:[#allocation17 + $0x18] sm:$0xff] (!%p654_p0)  ;;  %v1883_v28 = vld [vmem:[#allocation21] ss:$0 sm:$0xff] (!%p654_p0)  ;;  %1161 = vst.msk [vmem:[#allocation7 + $0x8] sm:$0xff] (!%p654_p0), %vm1149_vm2, %v2680_v3 }
 0x12c   : > { %2013 = vmatprep.mubr.bf16.mxu1 (!%p654_p0), %v3177_v14  ;;  %v2235_v25 = vld [vmem:[#allocation18 + $0x38] sm:$0xff] (!%p654_p0)   ;;  %v669_v26 = vpack.c.bf16 (!%p654_p0), %v665_v24, %v664_v23  ;;  %v1874_v36 = vld [vmem:[#allocation20] ss:$0 sm:$0xff] (!%p654_p0) }
 0x12d   : > { %v2220_v1 = vld [vmem:[%s3457_s14] sm:$0xff] (!%p654_p0)   ;;  %v2221_v2 = vld [vmem:[%s3457_s14 + $0x8] sm:$0xff] (!%p654_p0)   ;;  %v2223_v5 = vld [vmem:[%s3457_s14 + $0x10] sm:$0xff] (!%p654_p0)   ;;  %1980 = vmatpush3.bf16.msra.mxu0 (!%p654_p0), %v2224_v6  ;;  %667 = vst [vmem:[#allocation3] sm:$0xff] (!%p654_p0), %v666_v18 }
 0x12e   : > { %1997 = vmatprep.subr.bf16.mxu1 (!%p654_p0), %v2220_v1  ;;  %v2225_v7 = vld [vmem:[%s3457_s14 + $0x18] sm:$0xff] (!%p654_p0)   ;;  %1981 = vmatprep.subr.bf16.mxu0 (!%p654_p0), %v2680_v3  ;;  %v2227_v9 = vld [vmem:[%s3457_s14 + $0x20] sm:$0xff] (!%p654_p0)   ;;  %v2229_v13 = vld [vmem:[%s3457_s14 + $0x28] sm:$0xff] (!%p654_p0)  }
 0x12f   : > { %1998 = vmatpush3.bf16.msra.mxu1 %v2220_v1  ;;  %v2231_v19 = vld [vmem:[%s3457_s14 + $0x30] sm:$0xff]   ;;  %v2233_v21 = vld [vmem:[%s3457_s14 + $0x38] sm:$0xff]  }
 0x130   : > { %1999 = vmatprep.subr.bf16.mxu1 %v2221_v2 }
 0x131   : > { %1982 = vmatpush3.bf16.msra.mxu0 %v2226_v8 }
 0x132   : > { %1983 = vmatprep.subr.bf16.mxu0 %v2680_v3 }
 0x133   : > { %2000 = vmatpush3.bf16.msra.mxu1 %v2221_v2 }
 0x134   : > { %2001 = vmatprep.subr.bf16.mxu1 %v2223_v5 }
 0x135   : > { %1984 = vmatpush3.bf16.msra.mxu0 %v2228_v10 }
 0x136   : > { %1985 = vmatprep.subr.bf16.mxu0 %v2680_v3 }
 0x137   : > { %2002 = vmatpush3.bf16.msra.mxu1 %v2223_v5 }
 0x138   : > { %2003 = vmatprep.subr.bf16.mxu1 %v2225_v7 }
 0x139   : > { %1986 = vmatpush3.bf16.msra.mxu0 %v2230_v15  ;;  %v1102_v15 = vlaneseq }
 0x13a   : > { %1987 = vmatprep.subr.bf16.mxu0 %v2680_v3 }
 0x13b   : > { %2004 = vmatpush3.bf16.msra.mxu1 %v2225_v7 }
 0x13c   : > { %2005 = vmatprep.subr.bf16.mxu1 %v2227_v9 }
 0x13d   : > { %1988 = vmatpush3.bf16.msra.mxu0 %v2232_v20  ;;  %v1101_v20 = vld [vmem:[%s3458_s11] sm:$0x7] }
 0x13e   : > { %1989 = vmatprep.subr.bf16.mxu0 %v2680_v3 }
 0x13f   : > { %2006 = vmatpush3.bf16.msra.mxu1 %v2227_v9 }
 0x140   : > { %2007 = vmatprep.subr.bf16.mxu1 %v2229_v13 }
 0x141   : > { %1990 = vmatpush3.bf16.msra.mxu0 %v2234_v22 }
 0x142   : > { %1991 = vmatprep.subr.bf16.mxu0 %v2680_v3 }
 0x143   : > { %2008 = vmatpush3.bf16.msra.mxu1 %v2229_v13 }
 0x144   : > { %2009 = vmatprep.subr.bf16.mxu1 %v2231_v19 }
 0x145   : > { %1992 = vmatpush3.bf16.msra.mxu0 %v2235_v25 }
 0x146   : > { %2017 = vmatprep.subr.bf16.mxu0 %v2680_v3 }
 0x147   : > { %2010 = vmatpush3.bf16.msra.mxu1 %v2231_v19 }
 0x148   : > { %2011 = vmatprep.subr.bf16.mxu1 %v2233_v21  ;;  %1994 = vmatmul.mubr.bf16.vlgmr.msra.gmra.mrb[0].mxu0 %v666_v18  ;;  %v1103_v18 = vshrl.u32 %v1102_v15, 7 }
 0x149   : > { %2019 = vmatprep.mubr.msk.bf16.mxu0 %vm2681_vm0, %v2680_v3 }
 0x14a   : > { %v1104_v19 = vsub.s32 0, %v1103_v18  ;;  %v1118_v22 = vsub.s32 2, %v1103_v18 }
 0x14b   : > { %2012 = vmatpush3.bf16.msra.mxu1 %v2233_v21  ;;  %v1110_v21 = vsub.s32 1, %v1103_v18 }
 0x14c   : > { %2023 = vmatprep.subr.bf16.mxu1 %v2680_v3  ;;  %v1105_v23 = vrot.slane %v1101_v20, %v1104_v19  ;;  %v1119_v25 = vrot.slane %v1101_v20, %v1118_v22 }
 0x14d   : > { %v1111_v24 = vrot.slane %v1101_v20, %v1110_v21 }
 0x14e   : > { %2014 = vmatmul.mubr.bf16.vlgmr.msra.gmra.mrb[0].mxu1 %v669_v26 }
 0x14f   : > { %2025 = vmatprep.mubr.msk.bf16.mxu1 %vm2681_vm0, %v2680_v3 }
 0x21b   : > { %v775_v30 = vpop.f32.mrb[0].mxu0 }
 0x21c   : > { %v1995_v32 = vpop.f32.mrb[1].mxu0  ;;  %v776_v44 = vadd.f32 %v1874_v36, %v775_v30 }
 0x21d   : > { %v778_v37 = vpop.f32.mrb[2].mxu0  ;;  %v661_v32 = vld [vmem:[#allocation12 + $0x8] sm:$0xff] }
 0x21e   : > { %v1996_v40 = vpop.f32.mrb[3].mxu0  ;;  %v779_v43 = vadd.f32 %v1874_v36, %v778_v37  ;;  %v902_v46 = vpack.c.bf16 %v776_v44, %v776_v44  ;;  %v1894_v44 = vld [vmem:[#allocation11] ss:$0 sm:$0xff] }
 0x21f   : > { %v1121_v40 = vmul.f32 %v1119_v25, %v661_v32 }
 0x220   : > { %v903_v45 = vpack.c.bf16 %v779_v43, %v779_v43 }
 0x221   : > { %v2015_v27 = vpop.f32.mrb[0].mxu1 }
 0x222   : > { %v887_v29 = vpop.f32.mrb[1].mxu1  ;;  %v896_v33 = vadd.f32 %v2015_v27, %v1883_v28  ;;  %v1106_v27 = vmul.f32 %v1105_v23, %v3181_v16 }
 0x223   : > { %v2016_v31 = vpop.f32.mrb[2].mxu1  ;;  %v888_v38 = vadd.f32 %v1883_v28, %v887_v29 }
 0x224   : > { %v899_v34 = vadd.f32 %v2016_v31, %v1883_v28  ;;  %v890_v35 = vpop.f32.mrb[3].mxu1 }
 0x225   : > { %v891_v39 = vadd.f32 %v1883_v28, %v890_v35  ;;  %v1107_v35 = vmul.f32 %v1105_v23, %v3183_v17 }
 0x226   : > { %v905_v41 = vpack.c.bf16 %v899_v34, %v896_v33 }
 0x227   : > { %v904_v42 = vpack.c.bf16 %v891_v39, %v888_v38 }
 0x228   : > { %2024 = vmatpush3.bf16.xpose.msra.mxu1 %v905_v41 }
 0x229   : > { %2018 = vmatpush3.bf16.xpose.msra.mxu0 %v904_v42  ;;  %2035 = vmatprep.subr.bf16.mxu1 %v2680_v3 }
 0x22a   : > { %2029 = vmatprep.subr.bf16.mxu0 %v2680_v3 }
 0x22f   : > { %2026 = vmatmul.mubr.bf16.vlgmr.msra.gmra.mrb[4].mxu1 %v903_v45 }
 0x230   : > { %2020 = vmatmul.mubr.bf16.vlgmr.msra.gmra.mrb[4].mxu0 %v902_v46  ;;  %2036 = vmatpush3.bf16.msra.mxu1 %v669_v26  ;;  %v660_v26 = vld [vmem:[#allocation12] sm:$0xff] }
 0x231   : > { %2030 = vmatpush3.bf16.msra.mxu0 %v3177_v14  ;;  %2031 = vmatprep.mubr.msk.bf16.mxu0 %vm2681_vm0, %v2680_v3  ;;  %v2682_v14 = vmov -1e+30   ;;  %v1120_v31 = vmul.f32 %v1119_v25, %v660_v26 }
 0x232   : > { %2037 = vmatprep.mubr.msk.bf16.mxu1 %vm2681_vm0, %v2680_v3  ;;  %1158 = vst.msk [vmem:[#allocation6] sm:$0xff] %vm1149_vm2, %v2682_v14  ;;  %1159 = vst.msk [vmem:[#allocation6 + $0x8] sm:$0xff] %vm1149_vm2, %v2682_v14 }
 0x302   : > { %v980_v47 = vpop.f32.mrb[4].mxu1 }
 0x303   : > { %v940_v48 = vpop.f32.mrb[4].mxu0  ;;  %v2027_v49 = vpop.f32.mrb[5].mxu1  ;;  %v987_v55 = vmul.f32 0.088388346, %v980_v47 }
 0x304   : > { %v986_v50 = vmul.f32 0.088388346, %v940_v48  ;;  %v2021_v51 = vpop.f32.mrb[5].mxu0  ;;  %v983_v52 = vpop.f32.mrb[6].mxu1 }
 0x305   : > { %v943_v53 = vpop.f32.mrb[6].mxu0  ;;  %v2028_v54 = vpop.f32.mrb[7].mxu1  ;;  %v992_v58 = vsel %vm988_vm1, %v987_v55, -inf }
 0x306   : > { %v2022_v56 = vpop.f32.mrb[7].mxu0  ;;  %v989_v57 = vsel %vm988_vm1, %v986_v50, -inf }
 0x307   : > { %990 = vmax.xlane.f32.xlu0 %v989_v57 }
 0x30b   : > { %993 = vmax.xlane.f32.xlu0 %v992_v58 }
 0x394   : > { %v991_v59 = vpop.xlane.xlu0 %990 }
 0x395   : > { %v995_v60 = vsub.f32 %v986_v50, %v991_v59 }
 0x397   : > { %v997_v61 = vmul.f32 1.442695, %v995_v60 }
 0x398   : > { %v994_v62 = vpop.xlane.xlu0 %993 }
 0x399   : > { %2236 = vpow2.f32 %v997_v61  ;;  %v996_v63 = vsub.f32 %v987_v55, %v994_v62 }
 0x39b   : > { %v999_v0 = vmul.f32 1.442695, %v996_v63 }
 0x39d   : > { %2238 = vpow2.f32 %v999_v0 }
 0x3a3   : > { %v2237_v1 = vpop.eup %2236 }
 0x3a4   : > { %v1001_v2 = vsel %vm988_vm1, %v2237_v1, 0.0 }
 0x3a5   : > { %1002 = vadd.xlane.f32.xlu1 %v1001_v2 }
 0x3a7   : > { %v2239_v4 = vpop.eup %2238 }
 0x3a8   : > { %v1004_v5 = vsel %vm988_vm1, %v2239_v4, 0.0 }
 0x3a9   : > { %1005 = vadd.xlane.f32.xlu1 %v1004_v5 }
 0x432   : > { %v1003_v6 = vpop.xlane.xlu1 %1002 }
 0x433   : > { %2240 = vrcp.f32 %v1003_v6 }
 0x436   : > { %v1006_v7 = vpop.xlane.xlu1 %1005 }
 0x437   : > { %2242 = vrcp.f32 %v1006_v7 }
 0x43d   : > { %v2241_v8 = vpop.eup %2240 }
 0x43e   : > { %v1009_v9 = vmul.f32 %v2241_v8, %v2237_v1 }
 0x440   : > { %1011 = vst.msk [vmem:[#allocation2] sm:$0xff] %vm988_vm1, %v1009_v9  ;;  %v1013_v10 = vpack.c.bf16 %v1009_v9, %v1009_v9 }
 0x441   : > { %v2243_v11 = vpop.eup %2242 }
 0x442   : > { %v1010_v12 = vmul.f32 %v2243_v11, %v2239_v4  ;;  %2032 = vmatmul.mubr.msk.bf16.vlgmr.msra.gmra.mrb[8].mxu0 %vm988_vm1, %v1013_v10 }
 0x444   : > { %1012 = vst.msk [vmem:[#allocation2 + $0x8] sm:$0xff] %vm988_vm1, %v1010_v12  ;;  %v1014_v13 = vpack.c.bf16 %v1010_v12, %v1010_v12 }
 0x446   : > { %2038 = vmatmul.mubr.msk.bf16.vlgmr.msra.gmra.mrb[8].mxu1 %vm988_vm1, %v1014_v13 }
 0x515   : > { %v1052_v28 = vpop.f32.mrb[8].mxu0 }
 0x516   : > { %v1112_v29 = vmul.f32 %v1111_v24, %v1052_v28  ;;  %v2033_v30 = vpop.f32.mrb[9].mxu0 }
 0x517   : > { %v1055_v3 = vpop.f32.mrb[10].mxu0 }
 0x518   : > { %v1114_v33 = vadd.f32 %v1112_v29, %v1106_v27  ;;  %v2034_v34 = vpop.f32.mrb[11].mxu0 }
 0x519   : > { %v1095_v36 = vpop.f32.mrb[8].mxu1 }
 0x51a   : > { %v1113_v37 = vmul.f32 %v1111_v24, %v1095_v36  ;;  %v2039_v38 = vpop.f32.mrb[9].mxu1  ;;  %v1122_v39 = vadd.f32 %v1120_v31, %v1114_v33 }
 0x51b   : > { %v1098_v41 = vpop.f32.mrb[10].mxu1 }
 0x51c   : > { %v1115_v42 = vadd.f32 %v1113_v37, %v1107_v35  ;;  %v2040_v43 = vpop.f32.mrb[11].mxu1  ;;  %1124 = vadd.xlane.f32.xlu0 %v1122_v39 }
 0x51e   : > { %v1123_v16 = vadd.f32 %v1121_v40, %v1115_v42 }
 0x520   : > { %1126 = vadd.xlane.f32.xlu1 %v1123_v16 }
 0x5a9   : > { %v1125_v45 = vpop.xlane.xlu0 %1124 }
 0x5aa   : > { %v1135_v46 = vadd.f32 %v1894_v44, %v1125_v45 }
 0x5ac   : > { %v1895_v47 = vmul.f32 -1.442695, %v1135_v46 }
 0x5ad   : > { %v1127_v48 = vpop.xlane.xlu1 %1126 }
 0x5ae   : > { %2244 = vpow2.f32 %v1895_v47  ;;  %v1136_v49 = vadd.f32 %v1894_v44, %v1127_v48 }
 0x5b0   : > { %v1896_v50 = vmul.f32 -1.442695, %v1136_v49 }
 0x5b2   : > { %2246 = vpow2.f32 %v1896_v50 }
 0x5b8   : > { %v2245_v17 = vpop.eup %2244 }
 0x5b9   : > { %v1143_v51 = vadd.f32 1.0, %v2245_v17 }
 0x5bb   : > { %2248 = vrcp.f32 %v1143_v51 }
 0x5bc   : > { %v2247_v52 = vpop.eup %2246 }
 0x5bd   : > { %v1144_v53 = vadd.f32 1.0, %v2247_v52 }
 0x5bf   : > { %2250 = vrcp.f32 %v1144_v53 }
 0x5c5   : > { %v2249_v54 = vpop.eup %2248 }
 0x5c6   : > { %1150 = vst.msk [vmem:[#allocation4] sm:$0xff] %vm1149_vm2, %v2249_v54  ;;  %2252 = vlog2.f32 %v2249_v54 }
 0x5c9   : > { %v2251_v55 = vpop.eup %2250 }
 0x5ca   : > { %1151 = vst.msk [vmem:[#allocation4 + $0x8] sm:$0xff] %vm1149_vm2, %v2251_v55  ;;  %2254 = vlog2.f32 %v2251_v55 }
 0x5d0   : > { %v2253_v56 = vpop.eup %2252 }
 0x5d1   : > { %v1153_v57 = vmul.f32 0.6931472, %v2253_v56 }
 0x5d3   : > { %1156 = vst.msk [vmem:[#allocation5] sm:$0xff] %vm1149_vm2, %v1153_v57 }
 0x5d4   : > { %v2255_v58 = vpop.eup %2254 }
 0x5d5   : > { %v1155_v59 = vmul.f32 0.6931472, %v2255_v58 }
 0x5d7   : > { %1157 = vst.msk [vmem:[#allocation5 + $0x8] sm:$0xff] %vm1149_vm2, %v1155_v59 }
 0x5d8 PF: > { %s3459_s17 = sld [smem:[#allocation34_spill]] }
 0x5de   : > { %p1897_p8 = scmp.ne.s32.totalorder %s3459_s17, 0 }
 0x5df   : > { %v2258_v60 = vld [vmem:[%s3131_s30 + $0x4] ss:$8 sps:$4 sm:$0xff] (!%p1897_p8)   ;;  %v2260_v61 = vld [vmem:[%s3131_s30] ss:$8 sps:$4 sm:$0xff] (!%p1897_p8)   ;;  %v2683_v62 = vmov (!%p1897_p8), 0   ;;  %s3460_s20 = sld [smem:[#allocation33_spill]] (!%p1897_p8)  ;;  %v1184_v15 = vlaneseq (!%p1897_p8) }
 0x5e0   : > { %1164 = sbr.rel (%p1897_p8) target bundleno = 2193 (0x891), region = 104  ;;  %1306 = vmatprep.mubr.bf16.mxu0 (!%p1897_p8), %v2683_v62  ;;  %2256 = vset.pattern.permute.xlu1 (!%p1897_p8), %v2683_v62  ;;  %v2261_v63 = vld [vmem:[%s3131_s30 + $0x14] ss:$8 sps:$4 sm:$0xff] (!%p1897_p8)   ;;  %v2263_v0 = vld [vmem:[%s3131_s30 + $0x10] ss:$8 sps:$4 sm:$0xff] (!%p1897_p8)   ;;  %vm1374_vm3 = vcmask (!%p1897_p8), 7168  }
 0x5e1   : > { %1274 = vmatprep.subr.bf16.mxu0 (!%p1897_p8), %v2258_v60  ;;  %2257 = vset.pattern.permute.xlu0 (!%p1897_p8), %v2683_v62  ;;  %v2264_v1 = vld [vmem:[%s3131_s30 + $0x24] ss:$8 sps:$4 sm:$0xff] (!%p1897_p8)   ;;  %v2266_v2 = vld [vmem:[%s3131_s30 + $0x20] ss:$8 sps:$4 sm:$0xff] (!%p1897_p8)   ;;  %v2267_v4 = vld [vmem:[%s3131_s30 + $0x34] ss:$8 sps:$4 sm:$0xff] (!%p1897_p8)  }
 0x5e2   : > { %1275 = vmatpush1.bf16.msra.mxu0 (!%p1897_p8), %v2260_v61  ;;  %v2269_v5 = vld [vmem:[%s3131_s30 + $0x30] ss:$8 sps:$4 sm:$0xff] (!%p1897_p8)   ;;  %v2270_v6 = vld [vmem:[%s3131_s30 + $0x44] ss:$8 sps:$4 sm:$0xff] (!%p1897_p8)   ;;  %v2272_v7 = vld [vmem:[%s3131_s30 + $0x40] ss:$8 sps:$4 sm:$0xff] (!%p1897_p8)  }
 0x5e3   : > { %1276 = vmatprep.subr.bf16.mxu0 (!%p1897_p8), %v2261_v63  ;;  %v2273_v8 = vld [vmem:[%s3131_s30 + $0x54] ss:$8 sps:$4 sm:$0xff] (!%p1897_p8)   ;;  %v2275_v9 = vld [vmem:[%s3131_s30 + $0x50] ss:$8 sps:$4 sm:$0xff] (!%p1897_p8)   ;;  %v2276_v10 = vld [vmem:[%s3131_s30 + $0x64] ss:$8 sps:$4 sm:$0xff] (!%p1897_p8)  }
 0x5e4   : > { %v2278_v11 = vld [vmem:[%s3131_s30 + $0x60] ss:$8 sps:$4 sm:$0xff] (!%p1897_p8)   ;;  %v2279_v12 = vld [vmem:[%s3131_s30 + $0x74] ss:$8 sps:$4 sm:$0xff] (!%p1897_p8)   ;;  %v2281_v13 = vld [vmem:[%s3131_s30 + $0x70] ss:$8 sps:$4 sm:$0xff] (!%p1897_p8)  }
 0x5e5   : > { %v1165_v14 = vld [vmem:[#allocation3] sm:$0xff] (!%p1897_p8)  ;;  %v1185_v18 = vshrl.u32 (!%p1897_p8), %v1184_v15, 7  ;;  %v1182_v20 = vld [vmem:[%s643_s5] sm:$0x3] (!%p1897_p8)  ;;  %s1947_s9 = sshll.u32 (!%p1897_p8), %s3460_s20, 5  ;;  %v1324_v33 = vld [vmem:[#allocation6] sm:$0xff] (!%p1897_p8) }
 0x5e6   : > { %1277 = vmatpush1.bf16.msra.mxu0 (!%p1897_p8), %v2263_v0  ;;  %s1319_s30 = scalar_lea.vmem (!%p1897_p8), [#allocation8], %s1947_s9  ;;  %v1325_v36 = vld [vmem:[#allocation6 + $0x8] sm:$0xff] (!%p1897_p8)  ;;  %v1334_v58 = vld [vmem:[#allocation7] sm:$0xff] (!%p1897_p8)  ;;  %v1335_v62 = vld [vmem:[#allocation7 + $0x8] sm:$0xff] (!%p1897_p8) }
 0x5e7   : > { %1278 = vmatprep.subr.bf16.mxu0 %v2264_v1  ;;  %v1186_v19 = vsub.s32 0, %v1185_v18  ;;  %v1190_v21 = vsub.s32 1, %v1185_v18 }
 0x5e9   : > { %v1187_v22 = vrot.slane %v1182_v20, %v1186_v19  ;;  %v1191_v23 = vrot.slane %v1182_v20, %v1190_v21 }
 0x5ea   : > { %1279 = vmatpush1.bf16.msra.mxu0 %v2266_v2 }
 0x5eb   : > { %1280 = vmatprep.subr.bf16.mxu0 %v2267_v4 }
 0x5ee   : > { %1281 = vmatpush1.bf16.msra.mxu0 %v2269_v5 }
 0x5ef   : > { %1282 = vmatprep.subr.bf16.mxu0 %v2270_v6 }
 0x5f2   : > { %1283 = vmatpush1.bf16.msra.mxu0 %v2272_v7 }
 0x5f3   : > { %1284 = vmatprep.subr.bf16.mxu0 %v2273_v8 }
 0x5f6   : > { %1285 = vmatpush1.bf16.msra.mxu0 %v2275_v9 }
 0x5f7   : > { %1286 = vmatprep.subr.bf16.mxu0 %v2276_v10 }
 0x5fa   : > { %1287 = vmatpush1.bf16.msra.mxu0 %v2278_v11 }
 0x5fb   : > { %1288 = vmatprep.subr.bf16.mxu0 %v2279_v12 }
 0x5fe   : > { %1289 = vmatpush1.bf16.msra.mxu0 %v2281_v13 }
 0x601   : > { %1307 = vmatmul.mubr.bf16.vlgmr.msra.gmra.mrb[0].mxu0 %v1165_v14 }
 0x6d4   : > { %v1308_v24 = vpop.f32.mrb[0].mxu0 }
 0x6d5   : > { %v1309_v25 = vadd.f32 %v1308_v24, %v1187_v22  ;;  %v1310_v26 = vpop.f32.mrb[1].mxu0 }
 0x6d6   : > { %v1311_v27 = vadd.f32 %v1310_v26, %v1191_v23  ;;  %v1312_v28 = vpop.f32.mrb[2].mxu0 }
 0x6d7   : > { %1320 = vst [vmem:[%s1319_s30] sm:$0xff] %v1309_v25  ;;  %v1313_v29 = vadd.f32 %v1312_v28, %v1187_v22  ;;  %v1314_v30 = vpop.f32.mrb[3].mxu0 }
 0x6d8   : > { %1321 = vst [vmem:[%s1319_s30 + $0x8] sm:$0xff] %v1311_v27  ;;  %v1315_v31 = vadd.f32 %v1314_v30, %v1191_v23  ;;  %v1326_v3 = vmax.f32 %v1309_v25, %v1311_v27 }
 0x6d9   : > { %1322 = vst [vmem:[%s1319_s30 + $0x10] sm:$0xff] %v1313_v29 }
 0x6da   : > { %1323 = vst [vmem:[%s1319_s30 + $0x18] sm:$0xff] %v1315_v31  ;;  %1327 = vmax.xlane.f32.xlu0 %v1326_v3  ;;  %v1329_v32 = vmax.f32 %v1313_v29, %v1315_v31 }
 0x6de   : > { %1330 = vmax.xlane.f32.xlu0 %v1329_v32 }
 0x767   : > { %v1328_v34 = vpop.xlane.xlu0 %1327 }
 0x768   : > { %v1332_v35 = vmax.f32 %v1324_v33, %v1328_v34 }
 0x76a   : > { %v1336_v37 = vsub.f32 %v1324_v33, %v1332_v35  ;;  %1377 = vst.msk [vmem:[#allocation6] sm:$0xff] %vm1374_vm3, %v1332_v35  ;;  %1346 = vperm.xlu1 %2256, %v1332_v35  }
 0x76b   : > { %v1331_v38 = vpop.xlane.xlu0 %1330 }
 0x76c   : > { %v1333_v39 = vmax.f32 %v1325_v36, %v1331_v38  ;;  %v1338_v55 = vmul.f32 1.442695, %v1336_v37 }
 0x76e   : > { %v1337_v40 = vsub.f32 %v1325_v36, %v1333_v39  ;;  %1378 = vst.msk [vmem:[#allocation6 + $0x8] sm:$0xff] %vm1374_vm3, %v1333_v39  ;;  %1351 = vperm.xlu1 %2256, %v1333_v39  }
 0x770   : > { %v1340_v56 = vmul.f32 1.442695, %v1337_v40 }
 0x7e9   : > { %v1347_v41 = vpop.permute.xlu1 %1346 }
 0x7ea   : > { %v1354_v42 = vsub.f32 %v1309_v25, %v1347_v41  ;;  %v1355_v43 = vsub.f32 %v1311_v27, %v1347_v41 }
 0x7ec   : > { %v1358_v16 = vmul.f32 1.442695, %v1354_v42  ;;  %v1360_v44 = vmul.f32 1.442695, %v1355_v43 }
 0x7ed   : > { %v1352_v45 = vpop.permute.xlu1 %1351 }
 0x7ee   : > { %2282 = vpow2.f32 %v1358_v16  ;;  %v1356_v46 = vsub.f32 %v1313_v29, %v1352_v45  ;;  %v1357_v47 = vsub.f32 %v1315_v31, %v1352_v45 }
 0x7ef   : > { %2284 = vpow2.f32 %v1360_v44 }
 0x7f0   : > { %v1362_v48 = vmul.f32 1.442695, %v1356_v46  ;;  %v1364_v49 = vmul.f32 1.442695, %v1357_v47 }
 0x7f2   : > { %2286 = vpow2.f32 %v1362_v48 }
 0x7f3   : > { %2288 = vpow2.f32 %v1364_v49 }
 0x7f4   : > { %2290 = vpow2.f32 %v1338_v55 }
 0x7f5   : > { %2292 = vpow2.f32 %v1340_v56 }
 0x7f8   : > { %v2283_v50 = vpop.eup %2282 }
 0x7f9   : > { %v2285_v17 = vpop.eup %2284 }
 0x7fa   : > { %v1366_v51 = vadd.f32 %v2285_v17, %v2283_v50 }
 0x7fc   : > { %v2287_v52 = vpop.eup %2286  ;;  %1367 = vadd.xlane.f32.xlu0 %v1366_v51 }
 0x7fd   : > { %v2289_v53 = vpop.eup %2288 }
 0x7fe   : > { %v1369_v54 = vadd.f32 %v2289_v53, %v2287_v52  ;;  %v2291_v57 = vpop.eup %2290 }
 0x7ff   : > { %v1342_v59 = vmul.f32 %v2291_v57, %v1334_v58  ;;  %v2293_v60 = vpop.eup %2292 }
 0x800   : > { %1370 = vadd.xlane.f32.xlu1 %v1369_v54  ;;  %v1343_v0 = vmul.f32 %v2293_v60, %v1335_v62 }
 0x889   : > { %v1368_v61 = vpop.xlane.xlu0 %1367 }
 0x88a   : > { %v1372_v63 = vadd.f32 %v1368_v61, %v1342_v59 }
 0x88c   : > { %1375 = vst.msk [vmem:[#allocation7] sm:$0xff] %vm1374_vm3, %v1372_v63 }
 0x88d   : > { %v1371_v1 = vpop.xlane.xlu1 %1370 }
 0x88e   : > { %v1373_v2 = vadd.f32 %v1371_v1, %v1343_v0 }
 0x890   : > { %1376 = vst.msk [vmem:[#allocation7 + $0x8] sm:$0xff] %vm1374_vm3, %v1373_v2 }
 0x891 PF: > { %s3462_s18 = sld [smem:[#allocation34_spill]] }
 0x897   : > { %p1916_p6 = scmp.ne.s32.totalorder %s3462_s18, 1 }
 0x898   : > { %v1392_v4 = vld [vmem:[#allocation7] sm:$0xff] (!%p1916_p6)  ;;  %s3463_s5 = sld [smem:[#allocation33_spill]] (!%p1916_p6)  ;;  %v2684_v5 = vmov (!%p1916_p6), 0   ;;  %v1393_v6 = vld [vmem:[#allocation7 + $0x8] sm:$0xff] (!%p1916_p6)  ;;  %v1390_v8 = vld [vmem:[#allocation6] sm:$0xff] (!%p1916_p6) }
 0x899   : > { %1382 = sbr.rel (%p1916_p6) target bundleno = 2740 (0xab4), region = 108  ;;  %2294 = vset.pattern.permute.xlu0 (!%p1916_p6), %v2684_v5  ;;  %2295 = vlog2.f32 (!%p1916_p6), %v1392_v4  ;;  %v1391_v11 = vld [vmem:[#allocation6 + $0x8] sm:$0xff] (!%p1916_p6) }
 0x89a   : > { %2297 = vlog2.f32 (!%p1916_p6), %v1393_v6 }
 0x89e   : > { %s1414_s13 = sshra.s32 (!%p1916_p6), %s3463_s5, 7  ;;  %s1419_s29 = sand.u32 (!%p1916_p6), 127, %s3463_s5 }
 0x89f   : > { %s1919_s15 = sshll.u32 (!%p1916_p6), %s1414_s13, 7  ;;  %s1948_s17 = sshll.u32 (!%p1916_p6), %s3463_s5, 5 }
 0x8a0   : > { %s1420_s4 = sadd.s32 %s1919_s15, %s1419_s29  ;;  %s1385_s20 = scalar_lea.vmem [#allocation8], %s1948_s17 }
 0x8a1   : > { %s3262_s11 = sld [smem:[#allocation10 + %s1420_s4]]  ;;  %v1386_v15 = vld [vmem:[%s1385_s20] sm:$0xff]  ;;  %v1387_v18 = vld [vmem:[%s1385_s20 + $0x8] sm:$0xff]  ;;  %v1388_v22 = vld [vmem:[%s1385_s20 + $0x10] sm:$0xff] }
 0x8a2   : > { %v1389_v23 = vld [vmem:[%s1385_s20 + $0x18] sm:$0xff] }
 0x8a3   : > { %v2296_v7 = vpop.eup %2295 }
 0x8a4   : > { %v2298_v9 = vpop.eup %2297  ;;  %v1395_v10 = vmul.f32 0.6931472, %v2296_v7 }
 0x8a5   : > { %v1397_v12 = vmul.f32 0.6931472, %v2298_v9 }
 0x8a6   : > { %v1398_v13 = vadd.f32 %v1395_v10, %v1390_v8 }
 0x8a7   : > { %v1399_v14 = vadd.f32 %v1397_v12, %v1391_v11  ;;  %p1920_p12 = scmp.ne.s32.totalorder %s3262_s11, 0 }
 0x8a8   : > { %1402 = vperm.xlu0 %2294, %v1398_v13   ;;  %v1426_v27 = vld [vmem:[#allocation5] sm:$0xff] (!%p1920_p12)  ;;  %v2685_v28 = vmov (!%p1920_p12), 0   ;;  %v1427_v29 = vld [vmem:[#allocation5 + $0x8] sm:$0xff] (!%p1920_p12) }
 0x8ac   : > { %1407 = vperm.xlu0 %2294, %v1399_v14  }
 0x8b0   : > { %2299 = vset.pattern.permute.xlu0 (!%p1920_p12), %v2685_v28 }
 0x8b1   : > { %1430 = vperm.xlu0 (!%p1920_p12), %2299, %v1426_v27  }
 0x8b5   : > { %1435 = vperm.xlu0 (!%p1920_p12), %2299, %v1427_v29  }
 0x926   : > { %1425 = sbr.rel (%p1920_p12) target bundleno = 2360 (0x938), region = 112 }
 0x927   : > { %v1403_v19 = vpop.permute.xlu0 %1402 }
 0x928   : > { %v3265_v20 = vsub.f32 %v1386_v15, %v1403_v19  ;;  %v3267_v21 = vsub.f32 %v1387_v18, %v1403_v19 }
 0x92b   : > { %v1408_v24 = vpop.permute.xlu0 %1407 }
 0x92c   : > { %v3269_v25 = vsub.f32 %v1388_v22, %v1408_v24  ;;  %v3271_v26 = vsub.f32 %v1389_v23, %v1408_v24 }
 0x930   : > { %v1431_v30 = vpop.permute.xlu0 %1430 }
 0x931   : > { %v1438_v31 = vadd.f32 %v1431_v30, %v3265_v20  ;;  %v1439_v3 = vadd.f32 %v1431_v30, %v3267_v21 }
 0x933   : > { %1442 = vst [vmem:[%s3151_s7] sm:$0xff] %v1438_v31  ;;  %1443 = vst [vmem:[%s3151_s7 + $0x8] sm:$0xff] %v1439_v3 }
 0x934   : > { %v1436_v32 = vpop.permute.xlu0 %1435 }
 0x935   : > { %v1440_v33 = vadd.f32 %v1436_v32, %v3269_v25  ;;  %v1441_v34 = vadd.f32 %v1436_v32, %v3271_v26 }
 0x937   : > { %1444 = vst [vmem:[%s3151_s7 + $0x10] sm:$0xff] %v1440_v33  ;;  %1445 = vst [vmem:[%s3151_s7 + $0x18] sm:$0xff] %v1441_v34 }
 0x938 PF: > { %p1921_p1 = scmp.eq.s32.totalorder %s3262_s11, 0 }
 0x939   : > { %s3464_s24 = sld [smem:[#allocation39_spill]] (!%p1921_p1)  ;;  %v2686_v37 = vmov (!%p1921_p1), 0   ;;  %s3466_s4 = sld [smem:[#allocation33_spill]] (!%p1921_p1)  ;;  %v1603_v40 = vld [vmem:[#allocation4 + $0x8] sm:$0xff] (!%p1921_p1)  ;;  %v1602_v41 = vld [vmem:[#allocation4] sm:$0xff] (!%p1921_p1)  ;;  %v1459_v16 = vlaneseq (!%p1921_p1)  ;;  %v1510_v53 = vld [vmem:[#allocation2 + $0x8] sm:$0xff] (!%p1921_p1) }
 0x93a   : > { %1449 = sbr.rel (%p1921_p1) target bundleno = 2740 (0xab4), region = 116  ;;  %2301 = vset.pattern.permute.xlu1 (!%p1921_p1), %v2686_v37  ;;  %2300 = vset.pattern.permute.xlu0 (!%p1921_p1), %v2686_v37  ;;  %v1619_v42 = vsub.f32 (!%p1921_p1), 1.0, %v1603_v40  ;;  %v1618_v43 = vsub.f32 (!%p1921_p1), 1.0, %v1602_v41  ;;  %v1509_v52 = vld [vmem:[#allocation2] sm:$0xff] (!%p1921_p1)  ;;  %v2687_v54 = vmov (!%p1921_p1), 1.0|1.0   ;;  %v1512_v56 = vpack.c.bf16 (!%p1921_p1), %v1510_v53, %v1510_v53 }
 0x93b   : > { %1549 = vmatprep.mubr.bf16.mxu0 (!%p1921_p1), %v2686_v37  ;;  %1593 = vmatprep.mubr.bf16.mxu1 (!%p1921_p1), %v2686_v37  ;;  %v1460_v44 = vand.u32 (!%p1921_p1), 127, %v1459_v16  ;;  %v1511_v55 = vpack.c.bf16 (!%p1921_p1), %v1509_v52, %v1509_v52  ;;  %vm1513_vm0 = vcmask (!%p1921_p1), 130048   ;;  %v1454_v57 = vmul.f32 (!%p1921_p1), 1.442695, %v3269_v25 }
 0x93c   : > { %v1450_v58 = vmul.f32 (!%p1921_p1), 1.442695, %v3265_v20  ;;  %v1452_v59 = vmul.f32 (!%p1921_p1), 1.442695, %v3267_v21  ;;  %v1456_v60 = vmul.f32 (!%p1921_p1), 1.442695, %v3271_v26 }
 0x93d   : > { %v1461_v45 = vadd.s32 (!%p1921_p1), 128, %v1460_v44  ;;  %2302 = vpow2.f32 (!%p1921_p1), %v1454_v57 }
 0x93e   : > { %2304 = vpow2.f32 (!%p1921_p1), %v1450_v58 }
 0x93f   : > { %s3465_s9 = smov (!%p1921_p1), %s3464_s24  ;;  %v1467_v35 = vld [vmem:[%s3464_s24 + $0x10] sm:$0xff] (!%p1921_p1)  ;;  %s1922_s11 = sshll.u32 (!%p1921_p1), %s3466_s4, 8  ;;  %2306 = vpow2.f32 (!%p1921_p1), %v1452_v59 }
 0x940   : > { %v1465_v36 = vld [vmem:[%s3465_s9] sm:$0xff] (!%p1921_p1)  ;;  %1476 = vperm.xlu1 (!%p1921_p1), %2301, %v1467_v35   ;;  %v1468_v38 = vld [vmem:[%s3465_s9 + $0x18] sm:$0xff] (!%p1921_p1)  ;;  %v1466_v39 = vld [vmem:[%s3465_s9 + $0x8] sm:$0xff] (!%p1921_p1)  ;;  %v1462_v46 = vstv (!%p1921_p1), %s1922_s11  ;;  %2308 = vpow2.f32 (!%p1921_p1), %v1456_v60 }
 0x941   : > { %1470 = vperm.xlu0 %2300, %v1465_v36   ;;  %v1464_v49 = vadd.s32 %v1462_v46, %v1461_v45  ;;  %v1463_v50 = vadd.s32 %v1462_v46, %v1460_v44 }
 0x944   : > { %1479 = vperm.xlu1 %2301, %v1468_v38  }
 0x945   : > { %1473 = vperm.xlu0 %2300, %v1466_v39  }
 0x947   : > { %v2303_v63 = vpop.eup %2302 }
 0x948   : > { %1611 = vperm.xlu1 %2301, %v1603_v40   ;;  %v2305_v0 = vpop.eup %2304 }
 0x949   : > { %1606 = vperm.xlu0 %2300, %v1602_v41   ;;  %v2307_v1 = vpop.eup %2306 }
 0x94a   : > { %v2309_v4 = vpop.eup %2308 }
 0x94c   : > { %1627 = vperm.xlu1 %2301, %v1619_v42  }
 0x94d   : > { %1622 = vperm.xlu0 %2300, %v1618_v43  }
 0x9bf   : > { %v1477_v47 = vpop.permute.xlu1 %1476 }
 0x9c0   : > { %v1471_v48 = vpop.permute.xlu0 %1470  ;;  %vm1486_vm10 = vcmp.eq.s32.totalorder %v1477_v47, %v1464_v49  ;;  %vm1485_vm13 = vcmp.eq.s32.totalorder %v1477_v47, %v1463_v50 }
 0x9c1   : > { %vm1482_vm5 = vcmp.eq.s32.totalorder %v1471_v48, %v1464_v49  ;;  %vm1481_vm11 = vcmp.eq.s32.totalorder %v1471_v48, %v1463_v50 }
 0x9c3   : > { %v1480_v17 = vpop.permute.xlu1 %1479 }
 0x9c4   : > { %v1474_v51 = vpop.permute.xlu0 %1473  ;;  %vm1488_vm7 = vcmp.eq.s32.totalorder %v1480_v17, %v1464_v49  ;;  %vm1487_vm8 = vcmp.eq.s32.totalorder %v1480_v17, %v1463_v50 }
 0x9c5   : > { %vm1483_vm4 = vcmp.eq.s32.totalorder %v1474_v51, %v1463_v50  ;;  %vm1484_vm6 = vcmp.eq.s32.totalorder %v1474_v51, %v1464_v49  ;;  %vm1936_vm12 = vmpackc.low %vm1488_vm7, %vm1486_vm10 }
 0x9c6   : > { %vm1931_vm9 = vmpackc.low %vm1484_vm6, %vm1482_vm5  ;;  %1937 = vmatprep.subr.msk.bf16.mxu1 %vm1936_vm12, %v2687_v54 }
 0x9c7   : > { %1932 = vmatprep.subr.msk.bf16.mxu0 %vm1931_vm9, %v2687_v54  ;;  %vm1933_vm14 = vmpackc.low %vm1483_vm4, %vm1481_vm11  ;;  %v1612_v61 = vpop.permute.xlu1 %1611 }
 0x9c8   : > { %1934 = vmatpush1.bf16.msk.msra.mxu0 %vm1933_vm14, %v2687_v54  ;;  %vm1938_vm15 = vmpackc.low %vm1487_vm8, %vm1485_vm13  ;;  %v1607_v62 = vpop.permute.xlu0 %1606  ;;  %v1616_v11 = vmul.f32 %v2303_v63, %v1612_v61  ;;  %v1617_v19 = vmul.f32 %v2309_v4, %v1612_v61 }
 0x9c9   : > { %1939 = vmatpush1.bf16.msk.msra.mxu1 %vm1938_vm15, %v2687_v54  ;;  %v1614_v7 = vmul.f32 %v2305_v0, %v1607_v62  ;;  %v1615_v12 = vmul.f32 %v2307_v1, %v1607_v62 }
 0x9cb   : > { %1935 = vmatmul.mubr.msk.bf16.vlgmr.msra.gmra.mrb[0].mxu0 %vm1513_vm0, %v1511_v55  ;;  %v1628_v2 = vpop.permute.xlu1 %1627 }
 0x9cc   : > { %1940 = vmatmul.mubr.msk.bf16.vlgmr.msra.gmra.mrb[0].mxu1 %vm1513_vm0, %v1512_v56  ;;  %v1623_v5 = vpop.permute.xlu0 %1622 }
 0xa9e   : > { %v1551_v6 = vpop.f32.mrb[0].mxu0 }
 0xa9f   : > { %v1630_v8 = vmul.f32 %v1623_v5, %v1551_v6  ;;  %v1595_v9 = vpop.f32.mrb[0].mxu1  ;;  %v1553_v10 = vpop.f32.mrb[1].mxu0 }
 0xaa0   : > { %v1632_v13 = vmul.f32 %v1628_v2, %v1595_v9  ;;  %v1631_v14 = vmul.f32 %v1623_v5, %v1553_v10  ;;  %v1597_v15 = vpop.f32.mrb[1].mxu1  ;;  %v1555_v18 = vpop.f32.mrb[2].mxu0 }
 0xaa1   : > { %v1634_v20 = vadd.f32 %v1630_v8, %v1614_v7  ;;  %v1633_v21 = vmul.f32 %v1628_v2, %v1597_v15  ;;  %v1599_v22 = vpop.f32.mrb[2].mxu1  ;;  %v1556_v23 = vpop.f32.mrb[3].mxu0 }
 0xaa2   : > { %v1636_v24 = vadd.f32 %v1632_v13, %v1616_v11  ;;  %v1635_v25 = vadd.f32 %v1631_v14, %v1615_v12  ;;  %v1600_v26 = vpop.f32.mrb[3].mxu1 }
 0xaa3   : > { %2310 = vlog2.f32 %v1634_v20  ;;  %v1637_v27 = vadd.f32 %v1633_v21, %v1617_v19 }
 0xaa4   : > { %2312 = vlog2.f32 %v1636_v24 }
 0xaa5   : > { %2314 = vlog2.f32 %v1635_v25 }
 0xaa6   : > { %2316 = vlog2.f32 %v1637_v27 }
 0xaad   : > { %v2311_v28 = vpop.eup %2310 }
 0xaae   : > { %v2313_v29 = vpop.eup %2312  ;;  %v1639_v30 = vmul.f32 0.6931472, %v2311_v28 }
 0xaaf   : > { %v2315_v31 = vpop.eup %2314  ;;  %v1643_v3 = vmul.f32 0.6931472, %v2313_v29 }
 0xab0   : > { %v2317_v32 = vpop.eup %2316  ;;  %1646 = vst [vmem:[%s3151_s7] sm:$0xff] %v1639_v30  ;;  %v1641_v33 = vmul.f32 0.6931472, %v2315_v31 }
 0xab1   : > { %1648 = vst [vmem:[%s3151_s7 + $0x10] sm:$0xff] %v1643_v3  ;;  %v1645_v34 = vmul.f32 0.6931472, %v2317_v32 }
 0xab2   : > { %1647 = vst [vmem:[%s3151_s7 + $0x8] sm:$0xff] %v1641_v33 }
 0xab3   : > { %1649 = vst [vmem:[%s3151_s7 + $0x18] sm:$0xff] %v1645_v34 }
 0xab4 PF: > { %s3467_s17 = sld [smem:[#allocation34_spill]]  ;;  %s3468_s20 = sld [smem:[#allocation33_spill]] }
 0xab5   : > { %s1668_s10 = sshll.u32 %s3151_s7, 4  ;;  %s3469_s5 = sld [smem:[#allocation47_spill]]  ;;  %s3308_s10 = int_to_ptr.vmem [resolvable:$true] %s1668_s10 }
 0xab6   : > { %s3317_s15 = scalar_lea.sflag [#allocation14], %s621_s0  ;;  %s2526_s29 = scalar_lea.vmem %s3308_s10, 512 }
 0xab7   : > { %p2527_p13 = scmp.ne.s32.totalorder %s3308_s10, %s2526_s29  ;;  %p3470_p9 = scmp.ne.s32.totalorder %s3439_s1, 0 }
 0xab8   : > { %s2688_s7 = smov [#allocation24]  }
 0xab9   : > { %p2528_p11 = pnand %p2527_p13, %p3470_p9  ;;  %s2530_s4 = sshll.u32 %s2688_s7, 4  ;;  %s2531_s4 = int_to_ptr.vmem [resolvable:$false] %s2530_s4 }
 0xaba   : > { %s1658_s6 = smul.u32 %s3468_s20, %s3467_s17  ;;  %s2532_s11 = scalar_lea.vmem %s2531_s4, 1024 }
 0xabb   : > { %p2529_p4 = pneg %p2528_p11  ;;  %p2533_p2 = scmp.lt.s32.totalorder %s3308_s10, %s2531_s4 }
 0xabc   : > { %s1949_s24 = sshll.u32 %s1658_s6, 8  ;;  %p2534_p7 = scmp.lt.s32.totalorder %s2532_s11, %s2526_s29 }
 0xabd   : > { %s3313_s13 = scalar_lea.hbm %s3469_s5, %s1949_s24 }
 0xabe   : > { %p2535_p10 = por %p2534_p7, %p2533_p2 }
 0xac0   : > { %p2536_p3 = pnand %p2535_p10, %p2529_p4 }
 0xac2   : > { %2539 = shalt.err (!%p2536_p3)
}
 0xac3   : > { %s2540_s0 = scalar_lea.hbm %s3313_s13, 512  ;;  %s2544_s6 = scalar_lea.hbm %s3469_s5, 1024 }
 0xac4   : > { %p2541_p5 = scmp.ne.s32.totalorder %s3313_s13, %s2540_s0  ;;  %p2545_p6 = scmp.lt.u32.totalorder %s3313_s13, %s3469_s5 }
 0xac5   : > { %p2546_p12 = scmp.lt.u32.totalorder %s2544_s6, %s2540_s0  ;;  %p2548_p13 = scmp.lt.u32.totalorder %s2540_s0, %s3313_s13 }
 0xac6   : > { %p2542_p0 = pnand %p2541_p5, %p3470_p9 }
 0xac7   : > { %p2547_p1 = por %p2546_p12, %p2545_p6 }
 0xac8   : > { %p2543_p8 = pneg %p2542_p0 }
 0xac9   : > { %p2549_p11 = por %p2548_p13, %p2547_p1 }
 0xacb   : > { %p2550_p4 = pnand %p2549_p11, %p2543_p8 }
 0xacd   : > { %2553 = shalt.err (!%p2550_p4)
}
 0xace   : > { %s2689_s18 = smov 256   ;;  %s2690_s29 = smov 512  }
 0xacf   : > { %s2691_s7 = smov 16  }
 0xad0   : > { %2067 = dma.vmem_to_hbm [thread:$0]  (%p3470_p9), %s3308_s10, 512, %s3313_s13, %s3317_s15, %s2689_s18, %s2690_s29, %s2691_s7  }
 0xad1 PF: > { %s3471_s4 = sld [smem:[#allocation32_spill]]  ;;  %p2109_p2 = scmp.ge.s32.totalorder %s2666_s28, 2 }
 0xad2   : > { %p3472_p7 = scmp.ne.s32.totalorder %s3441_s25, 0 }
 0xad4   : > { %p2093_p10 = pnand %p2109_p2, %p3472_p7 }
 0xad7   : > { %s1683_s11 = sand.u32 1, %s3471_s4  }
 0xad8   : > { %s1684_s0 = scalar_lea.sflag [#allocation14], %s1683_s11 }
 0xad9   : > { %2621 = dma.done.wait (!%p2093_p10), %s1684_s0, 512  }
 0xada   : > { %2623 = vsyncadd (!%p2093_p10), %s1684_s0, 4294966784  ;;  %s36_s28 = sadd.s32 1, %s2666_s28   ;;  %s3473_s20 = smov %s2630_s21 }
 0xadb   : > { %p33_p3 = scmp.ge.s32.totalorder %s36_s28, 6   ;;  %s3474_s21 = smov %s2634_s22 }
 0xadc   : > { %s3475_s22 = smov %s3052_s2  ;;  %s3476_s0 = smov %s2642_s23 }
 0xadd   : > { %s3477_s23 = smov %s2646_s12  ;;  %s3478_s12 = smov %s3055_s3 }
 0xade   : > { %s3479_s24 = smov %s2658_s26  ;;  %s3480_s25 = smov %s2662_s27 }
 0xadf   : > { %s3481_s26 = smov %s3484_s16  ;;  %s3482_s27 = smov %s3488_s19 }
 0xae0   :  { %35 = sbr.rel (!%p33_p3) target bundleno = 30 (0x1e), region = 167 }
 0xae7   :  { %1689 = vsyncpa [#allocation13], 1 }
 0xae8   :  { %1691 = vsyncpa [#allocation13 + $0x1], 1 }
 0xae9   :  { %1692 = vsyncpa [#allocation16], 1 }
 0xaea   :  { %1693 = vsyncpa [#allocation19], 1 }
 0xaeb   :  { %1694 = vsyncpa [#allocation22], 1 }
 0xaec   :  { %1695 = vsyncpa [#allocation14], 1 }
 0xaed   :  { %1697 = vsyncpa [#allocation14 + $0x1], 1 }

</bundles_post_ra>
